<compile_context>
chip_gen: v5e
topology: v5e:2x2
jax: 0.10.0
libtpu: 0.0.40
codegen_flags: <defaults>
</compile_context>

<pallas_src>
import jax
import jax.numpy as jnp
from jax.experimental import pallas as pl
from jax.experimental.pallas import tpu as pltpu


# ----------------------------- Pallas kernel -------------------------------


def _make_fused_lstm_kernel(T, B, Bp, num_layers, hidden):
    """Build the fused kernel for fixed (T, B, Bp, num_layers, hidden)."""
    H = hidden
    bf16 = jnp.bfloat16

    def kernel(*refs):
        # refs layout (inputs, then output, then scratch):
        #   [0]                 x      (T*Bp, D)   f32, time-major, batch-padded
        #   [1] [2] [3]         layer0: W_ih (D,4H) bf16, W_hh (H,4H) bf16,
        #                               bias (1,4H) f32
        #   [4 + 2(l-1)] ...    layer l>=1: W_cat (2H,4H) bf16 (= [W_ih;W_hh]),
        #                                   bias  (1,4H)  f32
        #   [-4] [-3]           W_fc (H,O) bf16, b_fc (1,O) f32
        #   [-2]                out   (T*Bp, O) f32
        #   [-1]                slab  (T*Bp, H) f32 VMEM scratch (last-layer h)
        idx = 0
        x_ref = refs[idx]; idx += 1
        wih0_ref = refs[idx]; whh0_ref = refs[idx + 1]; b0_ref = refs[idx + 2]
        idx += 3
        wcat_refs, bias_refs = [], []
        for _ in range(1, num_layers):
            wcat_refs.append(refs[idx]); bias_refs.append(refs[idx + 1]); idx += 2
        wfc_ref = refs[idx]; bfc_ref = refs[idx + 1]; idx += 2
        out_ref = refs[idx]; slab_ref = refs[idx + 1]

        inp = x_ref[...]                                     # (T*Bp, D) f32

        # clamp upper bound = max over the last timestep of the ORIGINAL
        # input, REAL batch rows only (padded zero rows must not participate).
        upbound = jnp.max(inp[(T - 1) * Bp:(T - 1) * Bp + B, :])

        # Layer-0 input projection hoisted over all timesteps: one big MXU
        # matmul off the serial recurrence. bf16 operands, f32 accumulate.
        xw0 = jnp.dot(inp.astype(bf16), wih0_ref[...],
                      preferred_element_type=jnp.float32) + b0_ref[...]

        whh0 = whh0_ref[...]                                 # (H, 4H) bf16
        wcat = [w[...] for w in wcat_refs]                   # (2H, 4H) bf16
        bias = [b[...] for b in bias_refs]                   # (1, 4H) f32

        def cell(gates, c_prev):
            # Full-width activations (EUP slot), then lane slices.
            sg = jax.nn.sigmoid(gates)                       # (Bp, 4H)
            th = jnp.tanh(gates)                             # (Bp, 4H)
            i = sg[:, 0 * H:1 * H]
            f = sg[:, 1 * H:2 * H]
            g = th[:, 2 * H:3 * H]
            o = sg[:, 3 * H:4 * H]
            c_new = f * c_prev + i * g
            h_new = o * jnp.tanh(c_new)
            return h_new, c_new

        h = [jnp.zeros((Bp, H), jnp.float32) for _ in range(num_layers)]
        c = [jnp.zeros((Bp, H), jnp.float32) for _ in range(num_layers)]

        # Wavefront: time-outer / layer-inner.  T is a small compile-time
        # constant -> full unroll; h/c stay in vregs.
        for t in range(T):
            # layer 0: hoisted x-projection slice + recurrent matmul (K=H)
            gates0 = xw0[t * Bp:(t + 1) * Bp, :] + jnp.dot(
                h[0].astype(bf16), whh0, preferred_element_type=jnp.float32)
            h[0], c[0] = cell(gates0, c[0])

            # layers >= 1: previous layer's h_t fused into the recurrent
            # matmul via a concatenated operand (K = 2H).
            for l in range(1, num_layers):
                hin = jnp.concatenate([h[l - 1], h[l]], axis=-1).astype(bf16)
                gates = jnp.dot(hin, wcat[l - 1],
                                preferred_element_type=jnp.float32) + bias[l - 1]
                h[l], c[l] = cell(gates, c[l])

            # per-step store of the last layer's hidden state (aligned vst)
            slab_ref[t * Bp:(t + 1) * Bp, :] = h[num_layers - 1]

        # fc head: single 2D matmul over all timesteps, then clamp.
        hid = slab_ref[...]                                  # (T*Bp, H) f32
        y = jnp.dot(hid.astype(bf16), wfc_ref[...],
                    preferred_element_type=jnp.float32) + bfc_ref[...]
        out_ref[...] = jnp.clip(y, 0.0, upbound)             # contiguous store

    return kernel


# ------------------------------ JAX wrapper ---------------------------------


def lstm_forward(x, params):
    """Full forward pass of the PyTorch `LSTM` module (fused Pallas kernel)."""
    B, T, D = x.shape
    layers = params["layers"]
    num_layers = len(layers)
    H = layers[0][1].shape[0]
    O = params["w_fc"].shape[-1]
    bf16 = jnp.bfloat16

    # Pad batch to the sublane size so every per-step tile is vreg-aligned.
    Bp = ((B + 7) // 8) * 8

    # time-major, batch-padded, flattened to 2D (layout plumbing in wrapper).
    x_tm = jnp.transpose(x, (1, 0, 2))                       # (T, B, D)
    x_tm = jnp.pad(x_tm, ((0, 0), (0, Bp - B), (0, 0)))      # (T, Bp, D)
    x_tm = x_tm.reshape(T * Bp, D).astype(jnp.float32)

    # Weight packing: layer 0 keeps W_ih / W_hh separate (x-proj is hoisted);
    # layers >= 1 use the concatenated [W_ih; W_hh] operand.  bf16 weights.
    flat_w = []
    for l, (wih, whh, b) in enumerate(layers):
        if l == 0:
            flat_w += [wih.astype(bf16), whh.astype(bf16), b.astype(jnp.float32)]
        else:
            flat_w += [jnp.concatenate([wih, whh], axis=0).astype(bf16),
                       b.astype(jnp.float32)]
    w_fc = params["w_fc"].astype(bf16)
    b_fc = params["b_fc"].astype(jnp.float32)

    # advisory cost estimate
    flops = 2 * T * Bp * D * 4 * H          # layer-0 hoisted projection
    flops += 2 * T * Bp * H * 4 * H         # layer-0 recurrence
    flops += (num_layers - 1) * 2 * T * Bp * 2 * H * 4 * H   # layers >= 1
    flops += 2 * T * Bp * H * O             # fc
    transcendentals = T * Bp * num_layers * 9 * H            # 2 full-width + tanh(c)
    bytes_accessed = 4 * (x_tm.size + T * Bp * O) \
        + 2 * sum(int(w.size) for w in flat_w) \
        + 2 * int(w_fc.size) + 4 * int(b_fc.size)

    vmem = pl.BlockSpec(memory_space=pltpu.MemorySpace.VMEM)
    n_inputs = 1 + 3 + 2 * (num_layers - 1) + 2

    out_tm = pl.pallas_call(
        _make_fused_lstm_kernel(T, B, Bp, num_layers, H),
        out_shape=jax.ShapeDtypeStruct((T * Bp, O), jnp.float32),
        in_specs=[vmem] * n_inputs,
        out_specs=vmem,
        scratch_shapes=[pltpu.VMEM((T * Bp, H), jnp.float32)],
        cost_estimate=pl.CostEstimate(flops=int(flops),
                                      transcendentals=int(transcendentals),
                                      bytes_accessed=int(bytes_accessed)),
    )(x_tm, *flat_w, w_fc, b_fc)

    # back to batch-first (B, T, O), dropping padded batch rows.
    return out_tm.reshape(T, Bp, O)[:, :B, :].transpose(1, 0, 2)


# --------------------------- pure-JAX reference ------------------------------


def lstm_forward_ref(x, params):
    B, T, _ = x.shape
    h_seq = x
    for (wih, whh, b) in params["layers"]:
        H = whh.shape[0]
        h = jnp.zeros((B, H), jnp.float32)
        c = jnp.zeros((B, H), jnp.float32)
        outs = []
        for t in range(T):
            gates = h_seq[:, t, :] @ wih + h @ whh + b       # (B, 4H)
            i = jax.nn.sigmoid(gates[:, 0 * H:1 * H])
            f = jax.nn.sigmoid(gates[:, 1 * H:2 * H])
            g = jnp.tanh(gates[:, 2 * H:3 * H])
            o = jax.nn.sigmoid(gates[:, 3 * H:4 * H])
            c = f * c + i * g
            h = o * jnp.tanh(c)
            outs.append(h)
        h_seq = jnp.stack(outs, axis=1)
    y = jnp.einsum("bth,ho->bto", h_seq, params["w_fc"]) \
        + params["b_fc"].reshape(1, 1, -1)
    upbound = jnp.max(x[:, -1, :])
    return jnp.clip(y, 0.0, upbound)


# ----------------------------------- main ------------------------------------

if __name__ == "__main__":
    # Small shapes consistent with the module:
    B, T = 4, 8                      # batch, sequence length
    INPUT_SIZE, HIDDEN, LAYERS, OUTPUT = 8, 32, 2, 8   # 4*HIDDEN = 128 lanes

    key = jax.random.PRNGKey(0)
    stdv = 1.0 / jnp.sqrt(HIDDEN)    # PyTorch default uniform init range

    layers = []
    for l in range(LAYERS):
        d_in = INPUT_SIZE if l == 0 else HIDDEN
        key, k1, k2, k3, k4 = jax.random.split(key, 5)
        # Gate order (i, f, g, o), concatenated along the output dim so the
        # kernel does one (.., 4H) matmul per operand.
        wih = jax.random.uniform(k1, (d_in, 4 * HIDDEN), jnp.float32, -stdv, stdv)
        whh = jax.random.uniform(k2, (HIDDEN, 4 * HIDDEN), jnp.float32, -stdv, stdv)
        b_ih = jax.random.uniform(k3, (1, 4 * HIDDEN), jnp.float32, -stdv, stdv)
        b_hh = jax.random.uniform(k4, (1, 4 * HIDDEN), jnp.float32, -stdv, stdv)
        layers.append((wih, whh, b_ih + b_hh))

    key, k5, k6, kx = jax.random.split(key, 4)
    w_fc = jax.random.uniform(k5, (HIDDEN, OUTPUT), jnp.float32, -stdv, stdv)
    b_fc = jax.random.uniform(k6, (1, OUTPUT), jnp.float32, -stdv, stdv)

    params = {"layers": layers, "w_fc": w_fc, "b_fc": b_fc}

    x = jax.random.normal(kx, (B, T, INPUT_SIZE), jnp.float32)

    out = lstm_forward(x, params)
    out = jax.block_until_ready(out)

    ref = lstm_forward_ref(x, params)
    assert out.shape == (B, T, OUTPUT)
    # bf16 matmul operands (f32 accumulate) -> loosened tolerance vs f32 ref.
    assert jnp.allclose(out, ref, rtol=2e-2, atol=2e-2), "mismatch vs reference"

    print("KERNEL_OK")
</pallas_src>

<mosaic_0001>
module attributes {stable_mosaic.version = 11 : i64} {
  func.func @kernel(%arg0: memref<64x8xf32, #tpu.memory_space<vmem>>, %arg1: memref<8x128xbf16, #tpu.memory_space<vmem>>, %arg2: memref<32x128xbf16, #tpu.memory_space<vmem>>, %arg3: memref<1x128xf32, #tpu.memory_space<vmem>>, %arg4: memref<64x128xbf16, #tpu.memory_space<vmem>>, %arg5: memref<1x128xf32, #tpu.memory_space<vmem>>, %arg6: memref<32x8xbf16, #tpu.memory_space<vmem>>, %arg7: memref<1x8xf32, #tpu.memory_space<vmem>>, %arg8: memref<64x8xf32, #tpu.memory_space<vmem>>, %arg9: memref<64x32xf32, #tpu.memory_space<vmem>>) attributes {dimension_semantics = [], scalar_prefetch = 0 : i64, scratch_operands = 1 : i64, tpu.core_type = #tpu.core_type<tc>} {
    %c0 = arith.constant 0 : index
    %c0_0 = arith.constant 0 : index
    %0 = vector.load %arg0[%c0, %c0_0] : memref<64x8xf32, #tpu.memory_space<vmem>>, vector<64x8xf32>
    %1 = vector.extract_strided_slice %0 {offsets = [56, 0], sizes = [4, 8], strides = [1, 1]} : vector<64x8xf32> to vector<4x8xf32>
    %2 = vector.shape_cast %1 : vector<4x8xf32> to vector<1x4x8xf32>
    %cst = arith.constant dense<0xFF800000> : vector<1xf32>
    %3 = vector.multi_reduction <maximumf>, %2, %cst [1, 2] : vector<1x4x8xf32> to vector<1xf32>
    %4 = vector.shape_cast %3 : vector<1xf32> to vector<1x1x1xf32>
    %5 = vector.extract %4[0, 0, 0] : f32 from vector<1x1x1xf32>
    %6 = arith.truncf %0 : vector<64x8xf32> to vector<64x8xbf16>
    %c0_1 = arith.constant 0 : index
    %c0_2 = arith.constant 0 : index
    %7 = vector.load %arg1[%c0_1, %c0_2] : memref<8x128xbf16, #tpu.memory_space<vmem>>, vector<8x128xbf16>
    %cst_3 = arith.constant dense<0.000000e+00> : vector<64x128xf32>
    %8 = tpu.matmul %6, %7, %cst_3 {dimension_numbers = #tpu.dot_dimension_numbers<[1], [0], [0], [1], [0, 0, 1, 1], [], []>} : vector<64x8xbf16>, vector<8x128xbf16>, vector<64x128xf32> -> vector<64x128xf32>
    %c0_4 = arith.constant 0 : index
    %c0_5 = arith.constant 0 : index
    %9 = vector.load %arg3[%c0_4, %c0_5] : memref<1x128xf32, #tpu.memory_space<vmem>>, vector<1x128xf32>
    %10 = vector.broadcast %9 : vector<1x128xf32> to vector<64x128xf32>
    %11 = arith.addf %8, %10 : vector<64x128xf32>
    %c0_6 = arith.constant 0 : index
    %c0_7 = arith.constant 0 : index
    %12 = vector.load %arg2[%c0_6, %c0_7] : memref<32x128xbf16, #tpu.memory_space<vmem>>, vector<32x128xbf16>
    %c0_8 = arith.constant 0 : index
    %c0_9 = arith.constant 0 : index
    %13 = vector.load %arg4[%c0_8, %c0_9] : memref<64x128xbf16, #tpu.memory_space<vmem>>, vector<64x128xbf16>
    %c0_10 = arith.constant 0 : index
    %c0_11 = arith.constant 0 : index
    %14 = vector.load %arg5[%c0_10, %c0_11] : memref<1x128xf32, #tpu.memory_space<vmem>>, vector<1x128xf32>
    %cst_12 = arith.constant 0.000000e+00 : f32
    %15 = vector.broadcast %cst_12 : f32 to vector<8x32xf32>
    %cst_13 = arith.constant 0.000000e+00 : f32
    %16 = vector.broadcast %cst_13 : f32 to vector<8x32xf32>
    %cst_14 = arith.constant 0.000000e+00 : f32
    %17 = vector.broadcast %cst_14 : f32 to vector<8x32xf32>
    %cst_15 = arith.constant 0.000000e+00 : f32
    %18 = vector.broadcast %cst_15 : f32 to vector<8x32xf32>
    %19 = vector.extract_strided_slice %11 {offsets = [0, 0], sizes = [8, 128], strides = [1, 1]} : vector<64x128xf32> to vector<8x128xf32>
    %20 = arith.truncf %15 : vector<8x32xf32> to vector<8x32xbf16>
    %cst_16 = arith.constant dense<0.000000e+00> : vector<8x128xf32>
    %21 = tpu.matmul %20, %12, %cst_16 {dimension_numbers = #tpu.dot_dimension_numbers<[1], [0], [0], [1], [0, 0, 1, 1], [], []>} : vector<8x32xbf16>, vector<32x128xbf16>, vector<8x128xf32> -> vector<8x128xf32>
    %22 = arith.addf %19, %21 : vector<8x128xf32>
    %23 = arith.negf %22 : vector<8x128xf32>
    %24 = math.exp %23 : vector<8x128xf32>
    %cst_17 = arith.constant 1.000000e+00 : f32
    %25 = vector.broadcast %cst_17 : f32 to vector<8x128xf32>
    %26 = arith.addf %25, %24 : vector<8x128xf32>
    %27 = arith.divf %25, %26 : vector<8x128xf32>
    %28 = math.tanh %22 : vector<8x128xf32>
    %29 = vector.extract_strided_slice %27 {offsets = [0, 0], sizes = [8, 32], strides = [1, 1]} : vector<8x128xf32> to vector<8x32xf32>
    %30 = vector.extract_strided_slice %27 {offsets = [0, 32], sizes = [8, 32], strides = [1, 1]} : vector<8x128xf32> to vector<8x32xf32>
    %31 = vector.extract_strided_slice %28 {offsets = [0, 64], sizes = [8, 32], strides = [1, 1]} : vector<8x128xf32> to vector<8x32xf32>
    %32 = vector.extract_strided_slice %27 {offsets = [0, 96], sizes = [8, 32], strides = [1, 1]} : vector<8x128xf32> to vector<8x32xf32>
    %33 = arith.mulf %30, %17 : vector<8x32xf32>
    %34 = arith.mulf %29, %31 : vector<8x32xf32>
    %35 = arith.addf %33, %34 : vector<8x32xf32>
    %36 = math.tanh %35 : vector<8x32xf32>
    %37 = arith.mulf %32, %36 : vector<8x32xf32>
    %38 = tpu.concatenate %37, %16 in 1 : vector<8x32xf32>, vector<8x32xf32> -> vector<8x64xf32>
    %39 = arith.truncf %38 : vector<8x64xf32> to vector<8x64xbf16>
    %cst_18 = arith.constant dense<0.000000e+00> : vector<8x128xf32>
    %40 = tpu.matmul %39, %13, %cst_18 {dimension_numbers = #tpu.dot_dimension_numbers<[1], [0], [0], [1], [0, 0, 1, 1], [], []>} : vector<8x64xbf16>, vector<64x128xbf16>, vector<8x128xf32> -> vector<8x128xf32>
    %41 = vector.broadcast %14 : vector<1x128xf32> to vector<8x128xf32>
    %42 = arith.addf %40, %41 : vector<8x128xf32>
    %43 = arith.negf %42 : vector<8x128xf32>
    %44 = math.exp %43 : vector<8x128xf32>
    %cst_19 = arith.constant 1.000000e+00 : f32
    %45 = vector.broadcast %cst_19 : f32 to vector<8x128xf32>
    %46 = arith.addf %45, %44 : vector<8x128xf32>
    %47 = arith.divf %45, %46 : vector<8x128xf32>
    %48 = math.tanh %42 : vector<8x128xf32>
    %49 = vector.extract_strided_slice %47 {offsets = [0, 0], sizes = [8, 32], strides = [1, 1]} : vector<8x128xf32> to vector<8x32xf32>
    %50 = vector.extract_strided_slice %47 {offsets = [0, 32], sizes = [8, 32], strides = [1, 1]} : vector<8x128xf32> to vector<8x32xf32>
    %51 = vector.extract_strided_slice %48 {offsets = [0, 64], sizes = [8, 32], strides = [1, 1]} : vector<8x128xf32> to vector<8x32xf32>
    %52 = vector.extract_strided_slice %47 {offsets = [0, 96], sizes = [8, 32], strides = [1, 1]} : vector<8x128xf32> to vector<8x32xf32>
    %53 = arith.mulf %50, %18 : vector<8x32xf32>
    %54 = arith.mulf %49, %51 : vector<8x32xf32>
    %55 = arith.addf %53, %54 : vector<8x32xf32>
    %56 = math.tanh %55 : vector<8x32xf32>
    %57 = arith.mulf %52, %56 : vector<8x32xf32>
    %c0_20 = arith.constant 0 : index
    %c0_21 = arith.constant 0 : index
    %58 = vector.load %arg9[%c0_20, %c0_21] : memref<64x32xf32, #tpu.memory_space<vmem>>, vector<8x32xf32>
    tpu.vector_store %arg9[%c0_20, %c0_21], %57 {strides = array<i32>} : memref<64x32xf32, #tpu.memory_space<vmem>>, vector<8x32xf32>,
    %59 = vector.extract_strided_slice %11 {offsets = [8, 0], sizes = [8, 128], strides = [1, 1]} : vector<64x128xf32> to vector<8x128xf32>
    %60 = arith.truncf %37 : vector<8x32xf32> to vector<8x32xbf16>
    %cst_22 = arith.constant dense<0.000000e+00> : vector<8x128xf32>
    %61 = tpu.matmul %60, %12, %cst_22 {dimension_numbers = #tpu.dot_dimension_numbers<[1], [0], [0], [1], [0, 0, 1, 1], [], []>} : vector<8x32xbf16>, vector<32x128xbf16>, vector<8x128xf32> -> vector<8x128xf32>
    %62 = arith.addf %59, %61 : vector<8x128xf32>
    %63 = arith.negf %62 : vector<8x128xf32>
    %64 = math.exp %63 : vector<8x128xf32>
    %cst_23 = arith.constant 1.000000e+00 : f32
    %65 = vector.broadcast %cst_23 : f32 to vector<8x128xf32>
    %66 = arith.addf %65, %64 : vector<8x128xf32>
    %67 = arith.divf %65, %66 : vector<8x128xf32>
    %68 = math.tanh %62 : vector<8x128xf32>
    %69 = vector.extract_strided_slice %67 {offsets = [0, 0], sizes = [8, 32], strides = [1, 1]} : vector<8x128xf32> to vector<8x32xf32>
    %70 = vector.extract_strided_slice %67 {offsets = [0, 32], sizes = [8, 32], strides = [1, 1]} : vector<8x128xf32> to vector<8x32xf32>
    %71 = vector.extract_strided_slice %68 {offsets = [0, 64], sizes = [8, 32], strides = [1, 1]} : vector<8x128xf32> to vector<8x32xf32>
    %72 = vector.extract_strided_slice %67 {offsets = [0, 96], sizes = [8, 32], strides = [1, 1]} : vector<8x128xf32> to vector<8x32xf32>
    %73 = arith.mulf %70, %35 : vector<8x32xf32>
    %74 = arith.mulf %69, %71 : vector<8x32xf32>
    %75 = arith.addf %73, %74 : vector<8x32xf32>
    %76 = math.tanh %75 : vector<8x32xf32>
    %77 = arith.mulf %72, %76 : vector<8x32xf32>
    %78 = tpu.concatenate %77, %57 in 1 : vector<8x32xf32>, vector<8x32xf32> -> vector<8x64xf32>
    %79 = arith.truncf %78 : vector<8x64xf32> to vector<8x64xbf16>
    %cst_24 = arith.constant dense<0.000000e+00> : vector<8x128xf32>
    %80 = tpu.matmul %79, %13, %cst_24 {dimension_numbers = #tpu.dot_dimension_numbers<[1], [0], [0], [1], [0, 0, 1, 1], [], []>} : vector<8x64xbf16>, vector<64x128xbf16>, vector<8x128xf32> -> vector<8x128xf32>
    %81 = vector.broadcast %14 : vector<1x128xf32> to vector<8x128xf32>
    %82 = arith.addf %80, %81 : vector<8x128xf32>
    %83 = arith.negf %82 : vector<8x128xf32>
    %84 = math.exp %83 : vector<8x128xf32>
    %cst_25 = arith.constant 1.000000e+00 : f32
    %85 = vector.broadcast %cst_25 : f32 to vector<8x128xf32>
    %86 = arith.addf %85, %84 : vector<8x128xf32>
    %87 = arith.divf %85, %86 : vector<8x128xf32>
    %88 = math.tanh %82 : vector<8x128xf32>
    %89 = vector.extract_strided_slice %87 {offsets = [0, 0], sizes = [8, 32], strides = [1, 1]} : vector<8x128xf32> to vector<8x32xf32>
    %90 = vector.extract_strided_slice %87 {offsets = [0, 32], sizes = [8, 32], strides = [1, 1]} : vector<8x128xf32> to vector<8x32xf32>
    %91 = vector.extract_strided_slice %88 {offsets = [0, 64], sizes = [8, 32], strides = [1, 1]} : vector<8x128xf32> to vector<8x32xf32>
    %92 = vector.extract_strided_slice %87 {offsets = [0, 96], sizes = [8, 32], strides = [1, 1]} : vector<8x128xf32> to vector<8x32xf32>
    %93 = arith.mulf %90, %55 : vector<8x32xf32>
    %94 = arith.mulf %89, %91 : vector<8x32xf32>
    %95 = arith.addf %93, %94 : vector<8x32xf32>
    %96 = math.tanh %95 : vector<8x32xf32>
    %97 = arith.mulf %92, %96 : vector<8x32xf32>
    %c8 = arith.constant 8 : index
    %c0_26 = arith.constant 0 : index
    %98 = vector.load %arg9[%c8, %c0_26] : memref<64x32xf32, #tpu.memory_space<vmem>>, vector<8x32xf32>
    tpu.vector_store %arg9[%c8, %c0_26], %97 {strides = array<i32>} : memref<64x32xf32, #tpu.memory_space<vmem>>, vector<8x32xf32>,
    %99 = vector.extract_strided_slice %11 {offsets = [16, 0], sizes = [8, 128], strides = [1, 1]} : vector<64x128xf32> to vector<8x128xf32>
    %100 = arith.truncf %77 : vector<8x32xf32> to vector<8x32xbf16>
    %cst_27 = arith.constant dense<0.000000e+00> : vector<8x128xf32>
    %101 = tpu.matmul %100, %12, %cst_27 {dimension_numbers = #tpu.dot_dimension_numbers<[1], [0], [0], [1], [0, 0, 1, 1], [], []>} : vector<8x32xbf16>, vector<32x128xbf16>, vector<8x128xf32> -> vector<8x128xf32>
    %102 = arith.addf %99, %101 : vector<8x128xf32>
    %103 = arith.negf %102 : vector<8x128xf32>
    %104 = math.exp %103 : vector<8x128xf32>
    %cst_28 = arith.constant 1.000000e+00 : f32
    %105 = vector.broadcast %cst_28 : f32 to vector<8x128xf32>
    %106 = arith.addf %105, %104 : vector<8x128xf32>
    %107 = arith.divf %105, %106 : vector<8x128xf32>
    %108 = math.tanh %102 : vector<8x128xf32>
    %109 = vector.extract_strided_slice %107 {offsets = [0, 0], sizes = [8, 32], strides = [1, 1]} : vector<8x128xf32> to vector<8x32xf32>
    %110 = vector.extract_strided_slice %107 {offsets = [0, 32], sizes = [8, 32], strides = [1, 1]} : vector<8x128xf32> to vector<8x32xf32>
    %111 = vector.extract_strided_slice %108 {offsets = [0, 64], sizes = [8, 32], strides = [1, 1]} : vector<8x128xf32> to vector<8x32xf32>
    %112 = vector.extract_strided_slice %107 {offsets = [0, 96], sizes = [8, 32], strides = [1, 1]} : vector<8x128xf32> to vector<8x32xf32>
    %113 = arith.mulf %110, %75 : vector<8x32xf32>
    %114 = arith.mulf %109, %111 : vector<8x32xf32>
    %115 = arith.addf %113, %114 : vector<8x32xf32>
    %116 = math.tanh %115 : vector<8x32xf32>
    %117 = arith.mulf %112, %116 : vector<8x32xf32>
    %118 = tpu.concatenate %117, %97 in 1 : vector<8x32xf32>, vector<8x32xf32> -> vector<8x64xf32>
    %119 = arith.truncf %118 : vector<8x64xf32> to vector<8x64xbf16>
    %cst_29 = arith.constant dense<0.000000e+00> : vector<8x128xf32>
    %120 = tpu.matmul %119, %13, %cst_29 {dimension_numbers = #tpu.dot_dimension_numbers<[1], [0], [0], [1], [0, 0, 1, 1], [], []>} : vector<8x64xbf16>, vector<64x128xbf16>, vector<8x128xf32> -> vector<8x128xf32>
    %121 = vector.broadcast %14 : vector<1x128xf32> to vector<8x128xf32>
    %122 = arith.addf %120, %121 : vector<8x128xf32>
    %123 = arith.negf %122 : vector<8x128xf32>
    %124 = math.exp %123 : vector<8x128xf32>
    %cst_30 = arith.constant 1.000000e+00 : f32
    %125 = vector.broadcast %cst_30 : f32 to vector<8x128xf32>
    %126 = arith.addf %125, %124 : vector<8x128xf32>
    %127 = arith.divf %125, %126 : vector<8x128xf32>
    %128 = math.tanh %122 : vector<8x128xf32>
    %129 = vector.extract_strided_slice %127 {offsets = [0, 0], sizes = [8, 32], strides = [1, 1]} : vector<8x128xf32> to vector<8x32xf32>
    %130 = vector.extract_strided_slice %127 {offsets = [0, 32], sizes = [8, 32], strides = [1, 1]} : vector<8x128xf32> to vector<8x32xf32>
    %131 = vector.extract_strided_slice %128 {offsets = [0, 64], sizes = [8, 32], strides = [1, 1]} : vector<8x128xf32> to vector<8x32xf32>
    %132 = vector.extract_strided_slice %127 {offsets = [0, 96], sizes = [8, 32], strides = [1, 1]} : vector<8x128xf32> to vector<8x32xf32>
    %133 = arith.mulf %130, %95 : vector<8x32xf32>
    %134 = arith.mulf %129, %131 : vector<8x32xf32>
    %135 = arith.addf %133, %134 : vector<8x32xf32>
    %136 = math.tanh %135 : vector<8x32xf32>
    %137 = arith.mulf %132, %136 : vector<8x32xf32>
    %c16 = arith.constant 16 : index
    %c0_31 = arith.constant 0 : index
    %138 = vector.load %arg9[%c16, %c0_31] : memref<64x32xf32, #tpu.memory_space<vmem>>, vector<8x32xf32>
    tpu.vector_store %arg9[%c16, %c0_31], %137 {strides = array<i32>} : memref<64x32xf32, #tpu.memory_space<vmem>>, vector<8x32xf32>,
    %139 = vector.extract_strided_slice %11 {offsets = [24, 0], sizes = [8, 128], strides = [1, 1]} : vector<64x128xf32> to vector<8x128xf32>
    %140 = arith.truncf %117 : vector<8x32xf32> to vector<8x32xbf16>
    %cst_32 = arith.constant dense<0.000000e+00> : vector<8x128xf32>
    %141 = tpu.matmul %140, %12, %cst_32 {dimension_numbers = #tpu.dot_dimension_numbers<[1], [0], [0], [1], [0, 0, 1, 1], [], []>} : vector<8x32xbf16>, vector<32x128xbf16>, vector<8x128xf32> -> vector<8x128xf32>
    %142 = arith.addf %139, %141 : vector<8x128xf32>
    %143 = arith.negf %142 : vector<8x128xf32>
    %144 = math.exp %143 : vector<8x128xf32>
    %cst_33 = arith.constant 1.000000e+00 : f32
    %145 = vector.broadcast %cst_33 : f32 to vector<8x128xf32>
    %146 = arith.addf %145, %144 : vector<8x128xf32>
    %147 = arith.divf %145, %146 : vector<8x128xf32>
    %148 = math.tanh %142 : vector<8x128xf32>
    %149 = vector.extract_strided_slice %147 {offsets = [0, 0], sizes = [8, 32], strides = [1, 1]} : vector<8x128xf32> to vector<8x32xf32>
    %150 = vector.extract_strided_slice %147 {offsets = [0, 32], sizes = [8, 32], strides = [1, 1]} : vector<8x128xf32> to vector<8x32xf32>
    %151 = vector.extract_strided_slice %148 {offsets = [0, 64], sizes = [8, 32], strides = [1, 1]} : vector<8x128xf32> to vector<8x32xf32>
    %152 = vector.extract_strided_slice %147 {offsets = [0, 96], sizes = [8, 32], strides = [1, 1]} : vector<8x128xf32> to vector<8x32xf32>
    %153 = arith.mulf %150, %115 : vector<8x32xf32>
    %154 = arith.mulf %149, %151 : vector<8x32xf32>
    %155 = arith.addf %153, %154 : vector<8x32xf32>
    %156 = math.tanh %155 : vector<8x32xf32>
    %157 = arith.mulf %152, %156 : vector<8x32xf32>
    %158 = tpu.concatenate %157, %137 in 1 : vector<8x32xf32>, vector<8x32xf32> -> vector<8x64xf32>
    %159 = arith.truncf %158 : vector<8x64xf32> to vector<8x64xbf16>
    %cst_34 = arith.constant dense<0.000000e+00> : vector<8x128xf32>
    %160 = tpu.matmul %159, %13, %cst_34 {dimension_numbers = #tpu.dot_dimension_numbers<[1], [0], [0], [1], [0, 0, 1, 1], [], []>} : vector<8x64xbf16>, vector<64x128xbf16>, vector<8x128xf32> -> vector<8x128xf32>
    %161 = vector.broadcast %14 : vector<1x128xf32> to vector<8x128xf32>
    %162 = arith.addf %160, %161 : vector<8x128xf32>
    %163 = arith.negf %162 : vector<8x128xf32>
    %164 = math.exp %163 : vector<8x128xf32>
    %cst_35 = arith.constant 1.000000e+00 : f32
    %165 = vector.broadcast %cst_35 : f32 to vector<8x128xf32>
    %166 = arith.addf %165, %164 : vector<8x128xf32>
    %167 = arith.divf %165, %166 : vector<8x128xf32>
    %168 = math.tanh %162 : vector<8x128xf32>
    %169 = vector.extract_strided_slice %167 {offsets = [0, 0], sizes = [8, 32], strides = [1, 1]} : vector<8x128xf32> to vector<8x32xf32>
    %170 = vector.extract_strided_slice %167 {offsets = [0, 32], sizes = [8, 32], strides = [1, 1]} : vector<8x128xf32> to vector<8x32xf32>
    %171 = vector.extract_strided_slice %168 {offsets = [0, 64], sizes = [8, 32], strides = [1, 1]} : vector<8x128xf32> to vector<8x32xf32>
    %172 = vector.extract_strided_slice %167 {offsets = [0, 96], sizes = [8, 32], strides = [1, 1]} : vector<8x128xf32> to vector<8x32xf32>
    %173 = arith.mulf %170, %135 : vector<8x32xf32>
    %174 = arith.mulf %169, %171 : vector<8x32xf32>
    %175 = arith.addf %173, %174 : vector<8x32xf32>
    %176 = math.tanh %175 : vector<8x32xf32>
    %177 = arith.mulf %172, %176 : vector<8x32xf32>
    %c24 = arith.constant 24 : index
    %c0_36 = arith.constant 0 : index
    %178 = vector.load %arg9[%c24, %c0_36] : memref<64x32xf32, #tpu.memory_space<vmem>>, vector<8x32xf32>
    tpu.vector_store %arg9[%c24, %c0_36], %177 {strides = array<i32>} : memref<64x32xf32, #tpu.memory_space<vmem>>, vector<8x32xf32>,
    %179 = vector.extract_strided_slice %11 {offsets = [32, 0], sizes = [8, 128], strides = [1, 1]} : vector<64x128xf32> to vector<8x128xf32>
    %180 = arith.truncf %157 : vector<8x32xf32> to vector<8x32xbf16>
    %cst_37 = arith.constant dense<0.000000e+00> : vector<8x128xf32>
    %181 = tpu.matmul %180, %12, %cst_37 {dimension_numbers = #tpu.dot_dimension_numbers<[1], [0], [0], [1], [0, 0, 1, 1], [], []>} : vector<8x32xbf16>, vector<32x128xbf16>, vector<8x128xf32> -> vector<8x128xf32>
    %182 = arith.addf %179, %181 : vector<8x128xf32>
    %183 = arith.negf %182 : vector<8x128xf32>
    %184 = math.exp %183 : vector<8x128xf32>
    %cst_38 = arith.constant 1.000000e+00 : f32
    %185 = vector.broadcast %cst_38 : f32 to vector<8x128xf32>
    %186 = arith.addf %185, %184 : vector<8x128xf32>
    %187 = arith.divf %185, %186 : vector<8x128xf32>
    %188 = math.tanh %182 : vector<8x128xf32>
    %189 = vector.extract_strided_slice %187 {offsets = [0, 0], sizes = [8, 32], strides = [1, 1]} : vector<8x128xf32> to vector<8x32xf32>
    %190 = vector.extract_strided_slice %187 {offsets = [0, 32], sizes = [8, 32], strides = [1, 1]} : vector<8x128xf32> to vector<8x32xf32>
    %191 = vector.extract_strided_slice %188 {offsets = [0, 64], sizes = [8, 32], strides = [1, 1]} : vector<8x128xf32> to vector<8x32xf32>
    %192 = vector.extract_strided_slice %187 {offsets = [0, 96], sizes = [8, 32], strides = [1, 1]} : vector<8x128xf32> to vector<8x32xf32>
    %193 = arith.mulf %190, %155 : vector<8x32xf32>
    %194 = arith.mulf %189, %191 : vector<8x32xf32>
    %195 = arith.addf %193, %194 : vector<8x32xf32>
    %196 = math.tanh %195 : vector<8x32xf32>
    %197 = arith.mulf %192, %196 : vector<8x32xf32>
    %198 = tpu.concatenate %197, %177 in 1 : vector<8x32xf32>, vector<8x32xf32> -> vector<8x64xf32>
    %199 = arith.truncf %198 : vector<8x64xf32> to vector<8x64xbf16>
    %cst_39 = arith.constant dense<0.000000e+00> : vector<8x128xf32>
    %200 = tpu.matmul %199, %13, %cst_39 {dimension_numbers = #tpu.dot_dimension_numbers<[1], [0], [0], [1], [0, 0, 1, 1], [], []>} : vector<8x64xbf16>, vector<64x128xbf16>, vector<8x128xf32> -> vector<8x128xf32>
    %201 = vector.broadcast %14 : vector<1x128xf32> to vector<8x128xf32>
    %202 = arith.addf %200, %201 : vector<8x128xf32>
    %203 = arith.negf %202 : vector<8x128xf32>
    %204 = math.exp %203 : vector<8x128xf32>
    %cst_40 = arith.constant 1.000000e+00 : f32
    %205 = vector.broadcast %cst_40 : f32 to vector<8x128xf32>
    %206 = arith.addf %205, %204 : vector<8x128xf32>
    %207 = arith.divf %205, %206 : vector<8x128xf32>
    %208 = math.tanh %202 : vector<8x128xf32>
    %209 = vector.extract_strided_slice %207 {offsets = [0, 0], sizes = [8, 32], strides = [1, 1]} : vector<8x128xf32> to vector<8x32xf32>
    %210 = vector.extract_strided_slice %207 {offsets = [0, 32], sizes = [8, 32], strides = [1, 1]} : vector<8x128xf32> to vector<8x32xf32>
    %211 = vector.extract_strided_slice %208 {offsets = [0, 64], sizes = [8, 32], strides = [1, 1]} : vector<8x128xf32> to vector<8x32xf32>
    %212 = vector.extract_strided_slice %207 {offsets = [0, 96], sizes = [8, 32], strides = [1, 1]} : vector<8x128xf32> to vector<8x32xf32>
    %213 = arith.mulf %210, %175 : vector<8x32xf32>
    %214 = arith.mulf %209, %211 : vector<8x32xf32>
    %215 = arith.addf %213, %214 : vector<8x32xf32>
    %216 = math.tanh %215 : vector<8x32xf32>
    %217 = arith.mulf %212, %216 : vector<8x32xf32>
    %c32 = arith.constant 32 : index
    %c0_41 = arith.constant 0 : index
    %218 = vector.load %arg9[%c32, %c0_41] : memref<64x32xf32, #tpu.memory_space<vmem>>, vector<8x32xf32>
    tpu.vector_store %arg9[%c32, %c0_41], %217 {strides = array<i32>} : memref<64x32xf32, #tpu.memory_space<vmem>>, vector<8x32xf32>,
    %219 = vector.extract_strided_slice %11 {offsets = [40, 0], sizes = [8, 128], strides = [1, 1]} : vector<64x128xf32> to vector<8x128xf32>
    %220 = arith.truncf %197 : vector<8x32xf32> to vector<8x32xbf16>
    %cst_42 = arith.constant dense<0.000000e+00> : vector<8x128xf32>
    %221 = tpu.matmul %220, %12, %cst_42 {dimension_numbers = #tpu.dot_dimension_numbers<[1], [0], [0], [1], [0, 0, 1, 1], [], []>} : vector<8x32xbf16>, vector<32x128xbf16>, vector<8x128xf32> -> vector<8x128xf32>
    %222 = arith.addf %219, %221 : vector<8x128xf32>
    %223 = arith.negf %222 : vector<8x128xf32>
    %224 = math.exp %223 : vector<8x128xf32>
    %cst_43 = arith.constant 1.000000e+00 : f32
    %225 = vector.broadcast %cst_43 : f32 to vector<8x128xf32>
    %226 = arith.addf %225, %224 : vector<8x128xf32>
    %227 = arith.divf %225, %226 : vector<8x128xf32>
    %228 = math.tanh %222 : vector<8x128xf32>
    %229 = vector.extract_strided_slice %227 {offsets = [0, 0], sizes = [8, 32], strides = [1, 1]} : vector<8x128xf32> to vector<8x32xf32>
    %230 = vector.extract_strided_slice %227 {offsets = [0, 32], sizes = [8, 32], strides = [1, 1]} : vector<8x128xf32> to vector<8x32xf32>
    %231 = vector.extract_strided_slice %228 {offsets = [0, 64], sizes = [8, 32], strides = [1, 1]} : vector<8x128xf32> to vector<8x32xf32>
    %232 = vector.extract_strided_slice %227 {offsets = [0, 96], sizes = [8, 32], strides = [1, 1]} : vector<8x128xf32> to vector<8x32xf32>
    %233 = arith.mulf %230, %195 : vector<8x32xf32>
    %234 = arith.mulf %229, %231 : vector<8x32xf32>
    %235 = arith.addf %233, %234 : vector<8x32xf32>
    %236 = math.tanh %235 : vector<8x32xf32>
    %237 = arith.mulf %232, %236 : vector<8x32xf32>
    %238 = tpu.concatenate %237, %217 in 1 : vector<8x32xf32>, vector<8x32xf32> -> vector<8x64xf32>
    %239 = arith.truncf %238 : vector<8x64xf32> to vector<8x64xbf16>
    %cst_44 = arith.constant dense<0.000000e+00> : vector<8x128xf32>
    %240 = tpu.matmul %239, %13, %cst_44 {dimension_numbers = #tpu.dot_dimension_numbers<[1], [0], [0], [1], [0, 0, 1, 1], [], []>} : vector<8x64xbf16>, vector<64x128xbf16>, vector<8x128xf32> -> vector<8x128xf32>
    %241 = vector.broadcast %14 : vector<1x128xf32> to vector<8x128xf32>
    %242 = arith.addf %240, %241 : vector<8x128xf32>
    %243 = arith.negf %242 : vector<8x128xf32>
    %244 = math.exp %243 : vector<8x128xf32>
    %cst_45 = arith.constant 1.000000e+00 : f32
    %245 = vector.broadcast %cst_45 : f32 to vector<8x128xf32>
    %246 = arith.addf %245, %244 : vector<8x128xf32>
    %247 = arith.divf %245, %246 : vector<8x128xf32>
    %248 = math.tanh %242 : vector<8x128xf32>
    %249 = vector.extract_strided_slice %247 {offsets = [0, 0], sizes = [8, 32], strides = [1, 1]} : vector<8x128xf32> to vector<8x32xf32>
    %250 = vector.extract_strided_slice %247 {offsets = [0, 32], sizes = [8, 32], strides = [1, 1]} : vector<8x128xf32> to vector<8x32xf32>
    %251 = vector.extract_strided_slice %248 {offsets = [0, 64], sizes = [8, 32], strides = [1, 1]} : vector<8x128xf32> to vector<8x32xf32>
    %252 = vector.extract_strided_slice %247 {offsets = [0, 96], sizes = [8, 32], strides = [1, 1]} : vector<8x128xf32> to vector<8x32xf32>
    %253 = arith.mulf %250, %215 : vector<8x32xf32>
    %254 = arith.mulf %249, %251 : vector<8x32xf32>
    %255 = arith.addf %253, %254 : vector<8x32xf32>
    %256 = math.tanh %255 : vector<8x32xf32>
    %257 = arith.mulf %252, %256 : vector<8x32xf32>
    %c40 = arith.constant 40 : index
    %c0_46 = arith.constant 0 : index
    %258 = vector.load %arg9[%c40, %c0_46] : memref<64x32xf32, #tpu.memory_space<vmem>>, vector<8x32xf32>
    tpu.vector_store %arg9[%c40, %c0_46], %257 {strides = array<i32>} : memref<64x32xf32, #tpu.memory_space<vmem>>, vector<8x32xf32>,
    %259 = vector.extract_strided_slice %11 {offsets = [48, 0], sizes = [8, 128], strides = [1, 1]} : vector<64x128xf32> to vector<8x128xf32>
    %260 = arith.truncf %237 : vector<8x32xf32> to vector<8x32xbf16>
    %cst_47 = arith.constant dense<0.000000e+00> : vector<8x128xf32>
    %261 = tpu.matmul %260, %12, %cst_47 {dimension_numbers = #tpu.dot_dimension_numbers<[1], [0], [0], [1], [0, 0, 1, 1], [], []>} : vector<8x32xbf16>, vector<32x128xbf16>, vector<8x128xf32> -> vector<8x128xf32>
    %262 = arith.addf %259, %261 : vector<8x128xf32>
    %263 = arith.negf %262 : vector<8x128xf32>
    %264 = math.exp %263 : vector<8x128xf32>
    %cst_48 = arith.constant 1.000000e+00 : f32
    %265 = vector.broadcast %cst_48 : f32 to vector<8x128xf32>
    %266 = arith.addf %265, %264 : vector<8x128xf32>
    %267 = arith.divf %265, %266 : vector<8x128xf32>
    %268 = math.tanh %262 : vector<8x128xf32>
    %269 = vector.extract_strided_slice %267 {offsets = [0, 0], sizes = [8, 32], strides = [1, 1]} : vector<8x128xf32> to vector<8x32xf32>
    %270 = vector.extract_strided_slice %267 {offsets = [0, 32], sizes = [8, 32], strides = [1, 1]} : vector<8x128xf32> to vector<8x32xf32>
    %271 = vector.extract_strided_slice %268 {offsets = [0, 64], sizes = [8, 32], strides = [1, 1]} : vector<8x128xf32> to vector<8x32xf32>
    %272 = vector.extract_strided_slice %267 {offsets = [0, 96], sizes = [8, 32], strides = [1, 1]} : vector<8x128xf32> to vector<8x32xf32>
    %273 = arith.mulf %270, %235 : vector<8x32xf32>
    %274 = arith.mulf %269, %271 : vector<8x32xf32>
    %275 = arith.addf %273, %274 : vector<8x32xf32>
    %276 = math.tanh %275 : vector<8x32xf32>
    %277 = arith.mulf %272, %276 : vector<8x32xf32>
    %278 = tpu.concatenate %277, %257 in 1 : vector<8x32xf32>, vector<8x32xf32> -> vector<8x64xf32>
    %279 = arith.truncf %278 : vector<8x64xf32> to vector<8x64xbf16>
    %cst_49 = arith.constant dense<0.000000e+00> : vector<8x128xf32>
    %280 = tpu.matmul %279, %13, %cst_49 {dimension_numbers = #tpu.dot_dimension_numbers<[1], [0], [0], [1], [0, 0, 1, 1], [], []>} : vector<8x64xbf16>, vector<64x128xbf16>, vector<8x128xf32> -> vector<8x128xf32>
    %281 = vector.broadcast %14 : vector<1x128xf32> to vector<8x128xf32>
    %282 = arith.addf %280, %281 : vector<8x128xf32>
    %283 = arith.negf %282 : vector<8x128xf32>
    %284 = math.exp %283 : vector<8x128xf32>
    %cst_50 = arith.constant 1.000000e+00 : f32
    %285 = vector.broadcast %cst_50 : f32 to vector<8x128xf32>
    %286 = arith.addf %285, %284 : vector<8x128xf32>
    %287 = arith.divf %285, %286 : vector<8x128xf32>
    %288 = math.tanh %282 : vector<8x128xf32>
    %289 = vector.extract_strided_slice %287 {offsets = [0, 0], sizes = [8, 32], strides = [1, 1]} : vector<8x128xf32> to vector<8x32xf32>
    %290 = vector.extract_strided_slice %287 {offsets = [0, 32], sizes = [8, 32], strides = [1, 1]} : vector<8x128xf32> to vector<8x32xf32>
    %291 = vector.extract_strided_slice %288 {offsets = [0, 64], sizes = [8, 32], strides = [1, 1]} : vector<8x128xf32> to vector<8x32xf32>
    %292 = vector.extract_strided_slice %287 {offsets = [0, 96], sizes = [8, 32], strides = [1, 1]} : vector<8x128xf32> to vector<8x32xf32>
    %293 = arith.mulf %290, %255 : vector<8x32xf32>
    %294 = arith.mulf %289, %291 : vector<8x32xf32>
    %295 = arith.addf %293, %294 : vector<8x32xf32>
    %296 = math.tanh %295 : vector<8x32xf32>
    %297 = arith.mulf %292, %296 : vector<8x32xf32>
    %c48 = arith.constant 48 : index
    %c0_51 = arith.constant 0 : index
    %298 = vector.load %arg9[%c48, %c0_51] : memref<64x32xf32, #tpu.memory_space<vmem>>, vector<8x32xf32>
    tpu.vector_store %arg9[%c48, %c0_51], %297 {strides = array<i32>} : memref<64x32xf32, #tpu.memory_space<vmem>>, vector<8x32xf32>,
    %299 = vector.extract_strided_slice %11 {offsets = [56, 0], sizes = [8, 128], strides = [1, 1]} : vector<64x128xf32> to vector<8x128xf32>
    %300 = arith.truncf %277 : vector<8x32xf32> to vector<8x32xbf16>
    %cst_52 = arith.constant dense<0.000000e+00> : vector<8x128xf32>
    %301 = tpu.matmul %300, %12, %cst_52 {dimension_numbers = #tpu.dot_dimension_numbers<[1], [0], [0], [1], [0, 0, 1, 1], [], []>} : vector<8x32xbf16>, vector<32x128xbf16>, vector<8x128xf32> -> vector<8x128xf32>
    %302 = arith.addf %299, %301 : vector<8x128xf32>
    %303 = arith.negf %302 : vector<8x128xf32>
    %304 = math.exp %303 : vector<8x128xf32>
    %cst_53 = arith.constant 1.000000e+00 : f32
    %305 = vector.broadcast %cst_53 : f32 to vector<8x128xf32>
    %306 = arith.addf %305, %304 : vector<8x128xf32>
    %307 = arith.divf %305, %306 : vector<8x128xf32>
    %308 = math.tanh %302 : vector<8x128xf32>
    %309 = vector.extract_strided_slice %307 {offsets = [0, 0], sizes = [8, 32], strides = [1, 1]} : vector<8x128xf32> to vector<8x32xf32>
    %310 = vector.extract_strided_slice %307 {offsets = [0, 32], sizes = [8, 32], strides = [1, 1]} : vector<8x128xf32> to vector<8x32xf32>
    %311 = vector.extract_strided_slice %308 {offsets = [0, 64], sizes = [8, 32], strides = [1, 1]} : vector<8x128xf32> to vector<8x32xf32>
    %312 = vector.extract_strided_slice %307 {offsets = [0, 96], sizes = [8, 32], strides = [1, 1]} : vector<8x128xf32> to vector<8x32xf32>
    %313 = arith.mulf %310, %275 : vector<8x32xf32>
    %314 = arith.mulf %309, %311 : vector<8x32xf32>
    %315 = arith.addf %313, %314 : vector<8x32xf32>
    %316 = math.tanh %315 : vector<8x32xf32>
    %317 = arith.mulf %312, %316 : vector<8x32xf32>
    %318 = tpu.concatenate %317, %297 in 1 : vector<8x32xf32>, vector<8x32xf32> -> vector<8x64xf32>
    %319 = arith.truncf %318 : vector<8x64xf32> to vector<8x64xbf16>
    %cst_54 = arith.constant dense<0.000000e+00> : vector<8x128xf32>
    %320 = tpu.matmul %319, %13, %cst_54 {dimension_numbers = #tpu.dot_dimension_numbers<[1], [0], [0], [1], [0, 0, 1, 1], [], []>} : vector<8x64xbf16>, vector<64x128xbf16>, vector<8x128xf32> -> vector<8x128xf32>
    %321 = vector.broadcast %14 : vector<1x128xf32> to vector<8x128xf32>
    %322 = arith.addf %320, %321 : vector<8x128xf32>
    %323 = arith.negf %322 : vector<8x128xf32>
    %324 = math.exp %323 : vector<8x128xf32>
    %cst_55 = arith.constant 1.000000e+00 : f32
    %325 = vector.broadcast %cst_55 : f32 to vector<8x128xf32>
    %326 = arith.addf %325, %324 : vector<8x128xf32>
    %327 = arith.divf %325, %326 : vector<8x128xf32>
    %328 = math.tanh %322 : vector<8x128xf32>
    %329 = vector.extract_strided_slice %327 {offsets = [0, 0], sizes = [8, 32], strides = [1, 1]} : vector<8x128xf32> to vector<8x32xf32>
    %330 = vector.extract_strided_slice %327 {offsets = [0, 32], sizes = [8, 32], strides = [1, 1]} : vector<8x128xf32> to vector<8x32xf32>
    %331 = vector.extract_strided_slice %328 {offsets = [0, 64], sizes = [8, 32], strides = [1, 1]} : vector<8x128xf32> to vector<8x32xf32>
    %332 = vector.extract_strided_slice %327 {offsets = [0, 96], sizes = [8, 32], strides = [1, 1]} : vector<8x128xf32> to vector<8x32xf32>
    %333 = arith.mulf %330, %295 : vector<8x32xf32>
    %334 = arith.mulf %329, %331 : vector<8x32xf32>
    %335 = arith.addf %333, %334 : vector<8x32xf32>
    %336 = math.tanh %335 : vector<8x32xf32>
    %337 = arith.mulf %332, %336 : vector<8x32xf32>
    %c56 = arith.constant 56 : index
    %c0_56 = arith.constant 0 : index
    %338 = vector.load %arg9[%c56, %c0_56] : memref<64x32xf32, #tpu.memory_space<vmem>>, vector<8x32xf32>
    tpu.vector_store %arg9[%c56, %c0_56], %337 {strides = array<i32>} : memref<64x32xf32, #tpu.memory_space<vmem>>, vector<8x32xf32>,
    %c0_57 = arith.constant 0 : index
    %c0_58 = arith.constant 0 : index
    %339 = vector.load %arg9[%c0_57, %c0_58] : memref<64x32xf32, #tpu.memory_space<vmem>>, vector<64x32xf32>
    %340 = arith.truncf %339 : vector<64x32xf32> to vector<64x32xbf16>
    %c0_59 = arith.constant 0 : index
    %c0_60 = arith.constant 0 : index
    %341 = vector.load %arg6[%c0_59, %c0_60] : memref<32x8xbf16, #tpu.memory_space<vmem>>, vector<32x8xbf16>
    %cst_61 = arith.constant dense<0.000000e+00> : vector<64x8xf32>
    %342 = tpu.matmul %340, %341, %cst_61 {dimension_numbers = #tpu.dot_dimension_numbers<[1], [0], [0], [1], [0, 0, 1, 1], [], []>} : vector<64x32xbf16>, vector<32x8xbf16>, vector<64x8xf32> -> vector<64x8xf32>
    %c0_62 = arith.constant 0 : index
    %c0_63 = arith.constant 0 : index
    %343 = vector.load %arg7[%c0_62, %c0_63] : memref<1x8xf32, #tpu.memory_space<vmem>>, vector<1x8xf32>
    %344 = vector.broadcast %343 : vector<1x8xf32> to vector<64x8xf32>
    %345 = arith.addf %342, %344 : vector<64x8xf32>
    %cst_64 = arith.constant 0.000000e+00 : f32
    %346 = vector.broadcast %cst_64 : f32 to vector<64x8xf32>
    %347 = arith.maximumf %346, %345 : vector<64x8xf32>
    %348 = vector.broadcast %5 : f32 to vector<64x8xf32>
    %349 = arith.minimumf %348, %347 : vector<64x8xf32>
    %c0_65 = arith.constant 0 : index
    %c0_66 = arith.constant 0 : index
    %350 = vector.load %arg8[%c0_65, %c0_66] : memref<64x8xf32, #tpu.memory_space<vmem>>, vector<64x8xf32>
    tpu.vector_store %arg8[%c0_65, %c0_66], %349 {strides = array<i32>} : memref<64x8xf32, #tpu.memory_space<vmem>>, vector<64x8xf32>,
    return
  }
}

</mosaic_0001>

<bundles_post_ra>
// kernel: tpu_custom_call.1
= control target key start
LH: loop header
LB: loop body
LE: loop exit
PB: predicated region body
PF: predicated region fallthrough
CT: control target
= control target key end

     0   :  { %vm71_vm0 = vcmask 1043456   ;;  %vm58_vm1 = vcmask 64512   ;;  %v1474_v10 = vmov 0   ;;  %s1475_s19 = smov 64   ;;  %s1476_s20 = smov 32   ;;  %vm129_vm6 = vcmask 261120   ;;  %s1922_s1 = inlined_call_operand.vmem [shape: bf16[8,128], index: 1, kind: input, shape index: {}]   ;;  %s1923_s0 = inlined_call_operand.vmem [shape: f32[64,8], index: 0, kind: input, shape index: {}]   ;;  %s1924_s2 = inlined_call_operand.vmem [shape: bf16[32,128], index: 2, kind: input, shape index: {}]   ;;  %s1925_s3 = inlined_call_operand.vmem [shape: f32[1,128], index: 3, kind: input, shape index: {}]   ;;  %s1926_s4 = inlined_call_operand.vmem [shape: bf16[64,128], index: 4, kind: input, shape index: {}]   ;;  %s1927_s5 = inlined_call_operand.vmem [shape: f32[1,128], index: 5, kind: input, shape index: {}]   ;;  %s1928_s6 = inlined_call_operand.vmem [shape: bf16[32,8], index: 6, kind: input, shape index: {}]   ;;  %s1929_s7 = inlined_call_operand.vmem [shape: f32[1,8], index: 7, kind: input, shape index: {}]   ;;  %s1930_s8 = inlined_call_operand.vmem [shape: f32[64,8], index: 8, kind: output, shape index: {}]  }
   0x1   :  { %v53_v0 = vld [vmem:[%s1922_s1] sm:$0xf]  ;;  %v32_v1 = vld [vmem:[%s1923_s0 + $0x10] sm:$0xff]  ;;  %v33_v2 = vld [vmem:[%s1923_s0 + $0x18] sm:$0xff]  ;;  %vm217_vm7 = vcmask 523264  }
   0x2   :  { %v73_v3 = vsel %vm71_vm0, %v53_v0, 0  ;;  %v50_v4 = vpack.c.bf16 %v33_v2, %v32_v1  ;;  %v1534_v5 = vld [vmem:[%s1924_s2 + $0x8] sm:$0xff]  ;;  %v30_v6 = vld [vmem:[%s1923_s0] sm:$0xff]  ;;  %v1580_v41 = vld [vmem:[%s1926_s4 + $0x18] sm:$0xff] }
   0x3   :  { %v31_v7 = vld [vmem:[%s1923_s0 + $0x8] sm:$0xff]  ;;  %1332 = vmatpush.bf16.msra.mxu1 %v73_v3  ;;  %82 = vmatpush.bf16.msra.mxu0 %v73_v3  ;;  %v1546_v9 = vld [vmem:[%s1924_s2] sm:$0xff]  ;;  %v1586_v43 = vld [vmem:[%s1926_s4 + $0x10] sm:$0xff] }
   0x4   :  { %v49_v8 = vpack.c.bf16 %v31_v7, %v30_v6  ;;  %1333 = vmatpush.bf16.msra.mxu2 %v73_v3  ;;  %1334 = vmatpush.bf16.msra.mxu3 %v73_v3  ;;  %v1562_v13 = vld [vmem:[%s1925_s3] ss:$0 sm:$0xff]  ;;  %v35_v40 = vld [vmem:[%s1923_s0 + $0x28] sm:$0xff]  ;;  %v36_v49 = vld [vmem:[%s1923_s0 + $0x30] sm:$0xff] }
   0x5   :  { %v34_v39 = vld [vmem:[%s1923_s0 + $0x20] sm:$0xff]  ;;  %v1594_v44 = vld [vmem:[%s1926_s4 + $0x8] sm:$0xff]  ;;  %v37_v50 = vld [vmem:[%s1923_s0 + $0x38] sm:$0xff] }
   0x6   :  { %1254 = vmatmul.msk.bf16.vlgmr.msra.gmra.mxu1 %vm58_vm1, %v50_v4  ;;  %1253 = vmatmul.msk.bf16.vlgmr.msra.gmra.mxu0 %vm58_vm1, %v49_v8  ;;  %v51_v42 = vpack.c.bf16 %v35_v40, %v34_v39  ;;  %v1604_v48 = vld [vmem:[%s1926_s4] sm:$0xff]  ;;  %v52_v51 = vpack.c.bf16 %v37_v50, %v36_v49 }
   0x7   :  { %139 = vmatpush.bf16.msrb.mxu1 %v1534_v5  ;;  %914 = vmatpush.bf16.msrb.mxu0 %v1534_v5  ;;  %v1639_v58 = vld [vmem:[%s1927_s5] ss:$0 sm:$0xff] }
   0x8   :  { %289 = vmatpush.bf16.msrb.mxu3 %v1534_v5  ;;  %225 = vmatpush.bf16.msrb.mxu2 %v1580_v41 }
   0x9   :  { %1255 = vmatmul.msk.bf16.vlgmr.msra.gmra.mxu2 %vm58_vm1, %v51_v42  ;;  %1256 = vmatmul.msk.bf16.vlgmr.msra.gmra.mxu3 %vm58_vm1, %v52_v51 }
   0xb   :  { %140 = vmatpush.bf16.msrb.mxu1 %v1546_v9  ;;  %915 = vmatpush.bf16.msrb.mxu0 %v1546_v9 }
   0xc   :  { %290 = vmatpush.bf16.msrb.mxu3 %v1546_v9  ;;  %226 = vmatpush.bf16.msrb.mxu2 %v1586_v43 }
   0xf   :  { %350 = vmatpush.bf16.msra.mxu1 %v1580_v41 }
  0x10   :  { %227 = vmatpush.bf16.msrb.mxu2 %v1594_v44  ;;  %414 = vmatpush.bf16.msra.mxu3 %v1534_v5 }
  0x13   :  { %351 = vmatpush.bf16.msra.mxu1 %v1586_v43 }
  0x14   :  { %228 = vmatpush.bf16.msrb.mxu2 %v1604_v48  ;;  %415 = vmatpush.bf16.msra.mxu3 %v1546_v9 }
  0x16   :  { %141 = vmatmul.bf16.vlgmr.msrb.gmra.mxu1 %v1474_v10 }
  0x17   :  { %352 = vmatpush.bf16.msra.mxu1 %v1594_v44 }
  0x18   :  { %475 = vmatpush.bf16.msra.mxu2 %v1580_v41 }
  0x1b   :  { %353 = vmatpush.bf16.msra.mxu1 %v1604_v48 }
  0x1c   :  { %476 = vmatpush.bf16.msra.mxu2 %v1586_v43 }
  0x1f   :  { %539 = vmatpush.bf16.msrb.mxu1 %v1534_v5 }
  0x20   :  { %477 = vmatpush.bf16.msra.mxu2 %v1594_v44 }
  0x23   :  { %540 = vmatpush.bf16.msrb.mxu1 %v1546_v9 }
  0x24   :  { %478 = vmatpush.bf16.msra.mxu2 %v1604_v48 }
  0x83   :  { %v1555_v11 = vpop.f32.mrf.mxu1  ;;  %v84_v14 = vpop.f32.mrf.mxu0 }
  0x84   :  { %v85_v15 = vadd.f32 %v1562_v13, %v84_v14 }
  0x8b   :  { %v1557_v12 = vpop.f32.mrf.mxu1  ;;  %v86_v1 = vpop.f32.mrf.mxu0 }
  0x8c   :  { %v1632_v56 = vpop.f32.mrf.mxu2  ;;  %v1642_v61 = vpop.f32.mrf.mxu3  ;;  %v87_v2 = vadd.f32 %v1562_v13, %v86_v1 }
  0x93   :  { %v142_v16 = vpop.f32.mrf.mxu1 }
  0x94   :  { %v146_v17 = vadd.f32 %v142_v16, %v85_v15  ;;  %v1634_v57 = vpop.f32.mrf.mxu2  ;;  %v1645_v0 = vpop.f32.mrf.mxu3 }
  0x96   :  { %1343 = vtanh.f32 %v146_v17  ;;  %v1265_v20 = vmul.f32 -1.442695, %v146_v17 }
  0x98   :  { %1345 = vpow2.f32 %v1265_v20 }
  0x9b   :  { %v144_v18 = vpop.f32.mrf.mxu1 }
  0x9c   :  { %v1344_v19 = vpop.eup %1343 }
  0x9d   :  { %169 = vrot.lane.b32.xlu0 %v1344_v19, %s1475_s19 }
  0x9e   :  { %v1346_v21 = vpop.eup %1345 }
  0x9f   :  { %v150_v22 = vadd.f32 1.0, %v1346_v21 }
  0xa1   :  { %1347 = vrcp.f32 %v150_v22  ;;  %v162_v28 = vand.u32 2147483648, %v150_v22  ;;  %vm156_vm3 = vweird.f32 %v150_v22  ;;  %v160_v29 = vand.u32 2147483647, %v150_v22 }
  0xa3   :  { %v163_v31 = vor.u32 1.1754944e-38, %v162_v28  ;;  %vm161_vm5 = vcmp.eq.f32.partialorder %v160_v29, 8.507059e+37 }
  0xa7   :  { %v1348_v23 = vpop.eup %1347 }
  0xa8   :  { %v152_v24 = vmul.f32 %v1348_v23, %v150_v22  ;;  %vm157_vm2 = vweird.f32 %v1348_v23 }
  0xa9   :  { %vm158_vm4 = vmor %vm156_vm3, %vm157_vm2 }
  0xaa   :  { %v153_v25 = vsub.f32 1.0, %v152_v24 }
  0xac   :  { %v154_v26 = vmul.f32 %v1348_v23, %v153_v25 }
  0xae   :  { %v155_v27 = vadd.f32 %v1348_v23, %v154_v26 }
  0xb0   :  { %v159_v30 = vsel %vm158_vm4, %v1348_v23, %v155_v27 }
  0xb1   :  { %v164_v33 = vsel %vm161_vm5, %v163_v31, %v159_v30 }
  0xb2   :  { %v167_v35 = vmul.f32 0.0, %v164_v33 }
 0x10f   :  { %v170_v32 = vpop.permute.xlu0 %169 }
 0x110   :  { %v172_v34 = vmul.f32 %v170_v32, %v164_v33 }
 0x112   :  { %174 = vrot.lane.b32.xlu0 %v172_v34, %s1476_s20 }
 0x184   :  { %v175_v36 = vpop.permute.xlu0 %174 }
 0x185   :  { %v1567_v37 = vadd.f32 %v175_v36, %v167_v35 }
 0x187   :  { %1349 = vtanh.f32 %v1567_v37 }
 0x18d   :  { %v1350_v38 = vpop.eup %1349 }
 0x18e   :  { %180 = vrot.lane.b32.xlu1 %v1350_v38, %s1475_s19 }
 0x200   :  { %v181_v45 = vpop.permute.xlu1 %180 }
 0x201   :  { %v183_v46 = vmul.f32 %v181_v45, %v164_v33 }
 0x203   :  { %v276_v47 = vpack.c.bf16 %v183_v46, %v183_v46  ;;  %185 = vrot.lane.b32.xlu2 %v183_v46, %s1476_s20 }
 0x205   :  { %278 = vrot.lane.b32.xlu1 %v276_v47, %s1476_s20 }
 0x25d   :  { %v186_v52 = vpop.permute.xlu2 %185 }
 0x25e   :  { %v188_v53 = vsel %vm129_vm6, %v186_v52, 0.0 }
 0x25f   :  { %v189_v54 = vpack.c.bf16 %v188_v53, %v188_v53 }
 0x261   :  { %1282 = vmatmul.msk.bf16.vlgmr.msrb.gmra.mxu2 %vm217_vm7, %v189_v54 }
 0x262   :  { %664 = vmatpush.bf16.msrb.mxu2 %v1534_v5 }
 0x266   :  { %665 = vmatpush.bf16.msrb.mxu2 %v1546_v9 }
 0x277   :  { %v279_v55 = vpop.permute.xlu1 %278 }
 0x278   :  { %1284 = vmatmul.msk.bf16.vlgmr.msrb.gmra.mxu3 %vm129_vm6, %v279_v55 }
 0x279   :  { %600 = vmatpush.bf16.msrb.mxu3 %v1580_v41 }
 0x27d   :  { %601 = vmatpush.bf16.msrb.mxu3 %v1586_v43 }
 0x281   :  { %602 = vmatpush.bf16.msrb.mxu3 %v1594_v44 }
 0x285   :  { %603 = vmatpush.bf16.msrb.mxu3 %v1604_v48 }
 0x2e4   :  { %v230_v59 = vpop.f32.mrf.mxu2 }
 0x2e5   :  { %v231_v60 = vadd.f32 %v1639_v58, %v230_v59 }
 0x2e7   :  { %1351 = vtanh.f32 %v231_v60  ;;  %v1283_v10 = vmul.f32 -1.442695, %v231_v60 }
 0x2ec   :  { %v232_v62 = vpop.f32.mrf.mxu2 }
 0x2ed   :  { %v1352_v63 = vpop.eup %1351 }
 0x2ee   :  { %256 = vrot.lane.b32.xlu0 %v1352_v63, %s1475_s19 }
 0x2fb   :  { %v292_v3 = vpop.f32.mrf.mxu3 }
 0x2fc   :  { %v296_v4 = vadd.f32 %v292_v3, %v87_v2 }
 0x2fe   :  { %1353 = vtanh.f32 %v296_v4  ;;  %v1285_v8 = vmul.f32 -1.442695, %v296_v4 }
 0x300   :  { %1355 = vpow2.f32 %v1285_v8 }
 0x301   :  { %1357 = vpow2.f32 %v1283_v10 }
 0x303   :  { %v294_v6 = vpop.f32.mrf.mxu3 }
 0x304   :  { %v1354_v7 = vpop.eup %1353  ;;  %v90_v6 = vadd.f32 %v1562_v13, %v1555_v11 }
 0x305   :  { %319 = vrot.lane.b32.xlu2 %v1354_v7, %s1475_s19 }
 0x306   :  { %v1356_v14 = vpop.eup %1355 }
 0x307   :  { %v1358_v15 = vpop.eup %1357  ;;  %v300_v16 = vadd.f32 1.0, %v1356_v14 }
 0x308   :  { %v237_v17 = vadd.f32 1.0, %v1358_v15 }
 0x309   :  { %1359 = vrcp.f32 %v300_v16  ;;  %v312_v27 = vand.u32 2147483648, %v300_v16  ;;  %vm306_vm10 = vweird.f32 %v300_v16  ;;  %v310_v29 = vand.u32 2147483647, %v300_v16 }
 0x30a   :  { %1361 = vrcp.f32 %v237_v17  ;;  %v249_v30 = vand.u32 2147483648, %v237_v17  ;;  %vm243_vm12 = vweird.f32 %v237_v17  ;;  %v247_v31 = vand.u32 2147483647, %v237_v17 }
 0x30b   :  { %v313_v33 = vor.u32 1.1754944e-38, %v312_v27  ;;  %vm311_vm14 = vcmp.eq.f32.partialorder %v310_v29, 8.507059e+37 }
 0x30c   :  { %v250_v35 = vor.u32 1.1754944e-38, %v249_v30  ;;  %vm248_vm15 = vcmp.eq.f32.partialorder %v247_v31, 8.507059e+37 }
 0x30f   :  { %v1360_v18 = vpop.eup %1359 }
 0x310   :  { %v1362_v19 = vpop.eup %1361  ;;  %v302_v20 = vmul.f32 %v1360_v18, %v300_v16  ;;  %vm307_vm8 = vweird.f32 %v1360_v18 }
 0x311   :  { %v239_v21 = vmul.f32 %v1362_v19, %v237_v17  ;;  %vm244_vm9 = vweird.f32 %v1362_v19  ;;  %vm308_vm11 = vmor %vm306_vm10, %vm307_vm8 }
 0x312   :  { %v303_v22 = vsub.f32 1.0, %v302_v20  ;;  %vm245_vm13 = vmor %vm243_vm12, %vm244_vm9 }
 0x313   :  { %v240_v23 = vsub.f32 1.0, %v239_v21 }
 0x314   :  { %v304_v24 = vmul.f32 %v1360_v18, %v303_v22 }
 0x315   :  { %v241_v25 = vmul.f32 %v1362_v19, %v240_v23 }
 0x316   :  { %v305_v26 = vadd.f32 %v1360_v18, %v304_v24 }
 0x317   :  { %v242_v28 = vadd.f32 %v1362_v19, %v241_v25 }
 0x318   :  { %v309_v32 = vsel %vm308_vm11, %v1360_v18, %v305_v26 }
 0x319   :  { %v246_v34 = vsel %vm245_vm13, %v1362_v19, %v242_v28  ;;  %v314_v38 = vsel %vm311_vm14, %v313_v33, %v309_v32 }
 0x31a   :  { %v251_v42 = vsel %vm248_vm15, %v250_v35, %v246_v34  ;;  %v317_v51 = vmul.f32 %v314_v38, %v1567_v37 }
 0x31b   :  { %v254_v46 = vmul.f32 0.0, %v251_v42 }
 0x35f   :  { %v320_v36 = vpop.permute.xlu2 %319 }
 0x360   :  { %v322_v39 = vmul.f32 %v320_v36, %v314_v38  ;;  %v257_v40 = vpop.permute.xlu0 %256 }
 0x361   :  { %v259_v45 = vmul.f32 %v257_v40, %v251_v42 }
 0x362   :  { %324 = vrot.lane.b32.xlu1 %v322_v39, %s1476_s20 }
 0x363   :  { %261 = vrot.lane.b32.xlu2 %v259_v45, %s1476_s20 }
 0x3bd   :  { %v262_v47 = vpop.permute.xlu2 %261 }
 0x3be   :  { %v1651_v49 = vadd.f32 %v262_v47, %v254_v46 }
 0x3c0   :  { %1363 = vtanh.f32 %v1651_v49 }
 0x3c6   :  { %v1364_v50 = vpop.eup %1363 }
 0x3c7   :  { %267 = vrot.lane.b32.xlu1 %v1364_v50, %s1475_s19 }
 0x3d4   :  { %v325_v52 = vpop.permute.xlu1 %324 }
 0x3d5   :  { %v1656_v53 = vadd.f32 %v325_v52, %v317_v51 }
 0x3d7   :  { %1365 = vtanh.f32 %v1656_v53 }
 0x3dd   :  { %v1366_v54 = vpop.eup %1365 }
 0x3de   :  { %330 = vrot.lane.b32.xlu0 %v1366_v54, %s1475_s19 }
 0x439   :  { %v268_v55 = vpop.permute.xlu1 %267 }
 0x43a   :  { %v1660_v59 = vmul.f32 %v268_v55, %v251_v42 }
 0x43c   :  { %338 = vrot.lane.b32.xlu1 %v1660_v59, %s1475_s19 }
 0x450   :  { %v331_v60 = vpop.permute.xlu0 %330 }
 0x451   :  { %v333_v62 = vmul.f32 %v331_v60, %v314_v38 }
 0x453   :  { %v401_v63 = vpack.c.bf16 %v333_v62, %v333_v62  ;;  %335 = vrot.lane.b32.xlu0 %v333_v62, %s1476_s20 }
 0x455   :  { %403 = vrot.lane.b32.xlu2 %v401_v63, %s1476_s20 }
 0x4ae   :  { %v339_v1 = vpop.permute.xlu1 %338 }
 0x4af   :  { %v404_v37 = vpop.permute.xlu2 %403 }
 0x4b0   :  { %1288 = vmatmul.msk.bf16.vlgmr.msra.gmra.mxu3 %vm129_vm6, %v404_v37 }
 0x4b1   :  { %789 = vmatpush.bf16.msra.mxu3 %v1534_v5 }
 0x4b5   :  { %790 = vmatpush.bf16.msra.mxu3 %v1546_v9 }
 0x4c5   :  { %v336_v2 = vpop.permute.xlu0 %335 }
 0x4c6   :  { %v341_v3 = vsel %vm129_vm6, %v336_v2, %v339_v1 }
 0x4c7   :  { %v342_v4 = vpack.c.bf16 %v341_v3, %v341_v3 }
 0x4c9   :  { %1286 = vmatmul.msk.bf16.vlgmr.msra.gmra.mxu1 %vm217_vm7, %v342_v4 }
 0x4ca   :  { %725 = vmatpush.bf16.msra.mxu1 %v1580_v41 }
 0x4ce   :  { %726 = vmatpush.bf16.msra.mxu1 %v1586_v43 }
 0x4d2   :  { %727 = vmatpush.bf16.msra.mxu1 %v1594_v44 }
 0x4d6   :  { %728 = vmatpush.bf16.msra.mxu1 %v1604_v48 }
 0x533   :  { %v417_v7 = vpop.f32.mrf.mxu3 }
 0x534   :  { %v421_v8 = vadd.f32 %v417_v7, %v90_v6 }
 0x536   :  { %1367 = vtanh.f32 %v421_v8  ;;  %v1289_v20 = vmul.f32 -1.442695, %v421_v8 }
 0x53b   :  { %v419_v10 = vpop.f32.mrf.mxu3 }
 0x53c   :  { %v1368_v14 = vpop.eup %1367 }
 0x53d   :  { %444 = vrot.lane.b32.xlu0 %v1368_v14, %s1475_s19 }
 0x546   :  { %v355_v15 = vpop.f32.mrf.mxu1 }
 0x547   :  { %v356_v16 = vadd.f32 %v1639_v58, %v355_v15 }
 0x549   :  { %1369 = vtanh.f32 %v356_v16  ;;  %v1287_v19 = vmul.f32 -1.442695, %v356_v16 }
 0x54b   :  { %1371 = vpow2.f32 %v1287_v19 }
 0x54c   :  { %1373 = vpow2.f32 %v1289_v20 }
 0x54e   :  { %v357_v17 = vpop.f32.mrf.mxu1 }
 0x54f   :  { %v1370_v18 = vpop.eup %1369  ;;  %v92_v17 = vadd.f32 %v1562_v13, %v1557_v12 }
 0x550   :  { %381 = vrot.lane.b32.xlu2 %v1370_v18, %s1475_s19 }
 0x551   :  { %v1372_v11 = vpop.eup %1371 }
 0x552   :  { %v362_v21 = vadd.f32 1.0, %v1372_v11  ;;  %v1374_v22 = vpop.eup %1373 }
 0x553   :  { %v425_v23 = vadd.f32 1.0, %v1374_v22 }
 0x554   :  { %1375 = vrcp.f32 %v362_v21  ;;  %v374_v32 = vand.u32 2147483648, %v362_v21  ;;  %vm368_vm2 = vweird.f32 %v362_v21  ;;  %v372_v34 = vand.u32 2147483647, %v362_v21 }
 0x555   :  { %1377 = vrcp.f32 %v425_v23  ;;  %v437_v39 = vand.u32 2147483648, %v425_v23  ;;  %vm431_vm8 = vweird.f32 %v425_v23  ;;  %v435_v45 = vand.u32 2147483647, %v425_v23 }
 0x556   :  { %v375_v36 = vor.u32 1.1754944e-38, %v374_v32  ;;  %vm373_vm5 = vcmp.eq.f32.partialorder %v372_v34, 8.507059e+37 }
 0x557   :  { %v438_v50 = vor.u32 1.1754944e-38, %v437_v39  ;;  %vm436_vm10 = vcmp.eq.f32.partialorder %v435_v45, 8.507059e+37 }
 0x55a   :  { %v1376_v24 = vpop.eup %1375 }
 0x55b   :  { %v364_v25 = vmul.f32 %v1376_v24, %v362_v21  ;;  %v1378_v26 = vpop.eup %1377  ;;  %vm369_vm0 = vweird.f32 %v1376_v24 }
 0x55c   :  { %v427_v28 = vmul.f32 %v1378_v26, %v425_v23  ;;  %vm370_vm3 = vmor %vm368_vm2, %vm369_vm0  ;;  %vm432_vm4 = vweird.f32 %v1378_v26 }
 0x55d   :  { %v365_v27 = vsub.f32 1.0, %v364_v25  ;;  %vm433_vm9 = vmor %vm431_vm8, %vm432_vm4 }
 0x55e   :  { %v428_v30 = vsub.f32 1.0, %v427_v28 }
 0x55f   :  { %v366_v29 = vmul.f32 %v1376_v24, %v365_v27 }
 0x560   :  { %v429_v33 = vmul.f32 %v1378_v26, %v428_v30 }
 0x561   :  { %v367_v31 = vadd.f32 %v1376_v24, %v366_v29 }
 0x562   :  { %v430_v38 = vadd.f32 %v1378_v26, %v429_v33 }
 0x563   :  { %v371_v35 = vsel %vm370_vm3, %v1376_v24, %v367_v31 }
 0x564   :  { %v376_v40 = vsel %vm373_vm5, %v375_v36, %v371_v35  ;;  %v434_v47 = vsel %vm433_vm9, %v1378_v26, %v430_v38 }
 0x565   :  { %v439_v52 = vsel %vm436_vm10, %v438_v50, %v434_v47  ;;  %v379_v37 = vmul.f32 %v376_v40, %v1651_v49 }
 0x566   :  { %v442_v55 = vmul.f32 %v439_v52, %v1656_v53 }
 0x5aa   :  { %v382_v42 = vpop.permute.xlu2 %381 }
 0x5ab   :  { %v384_v46 = vmul.f32 %v382_v42, %v376_v40 }
 0x5ad   :  { %386 = vrot.lane.b32.xlu1 %v384_v46, %s1476_s20 }
 0x5af   :  { %v445_v51 = vpop.permute.xlu0 %444 }
 0x5b0   :  { %v447_v54 = vmul.f32 %v445_v51, %v439_v52 }
 0x5b2   :  { %449 = vrot.lane.b32.xlu2 %v447_v54, %s1476_s20 }
 0x60c   :  { %v450_v60 = vpop.permute.xlu2 %449 }
 0x60d   :  { %v1683_v62 = vadd.f32 %v450_v60, %v442_v55 }
 0x60f   :  { %1379 = vtanh.f32 %v1683_v62 }
 0x615   :  { %v1380_v63 = vpop.eup %1379 }
 0x616   :  { %455 = vrot.lane.b32.xlu1 %v1380_v63, %s1475_s19 }
 0x61f   :  { %v387_v1 = vpop.permute.xlu1 %386 }
 0x620   :  { %v1688_v2 = vadd.f32 %v387_v1, %v379_v37 }
 0x622   :  { %1381 = vtanh.f32 %v1688_v2 }
 0x628   :  { %v1382_v3 = vpop.eup %1381 }
 0x629   :  { %392 = vrot.lane.b32.xlu0 %v1382_v3, %s1475_s19 }
 0x688   :  { %v456_v4 = vpop.permute.xlu1 %455 }
 0x689   :  { %v458_v53 = vmul.f32 %v456_v4, %v439_v52 }
 0x68b   :  { %v526_v6 = vpack.c.bf16 %v458_v53, %v458_v53  ;;  %460 = vrot.lane.b32.xlu2 %v458_v53, %s1476_s20 }
 0x68d   :  { %528 = vrot.lane.b32.xlu1 %v526_v6, %s1476_s20 }
 0x69b   :  { %v393_v7 = vpop.permute.xlu0 %392 }
 0x69c   :  { %v1694_v8 = vmul.f32 %v393_v7, %v376_v40 }
 0x69e   :  { %463 = vrot.lane.b32.xlu0 %v1694_v8, %s1475_s19 }
 0x6e5   :  { %v461_v10 = vpop.permute.xlu2 %460 }
 0x6ff   :  { %v529_v49 = vpop.permute.xlu1 %528 }
 0x700   :  { %1292 = vmatmul.msk.bf16.vlgmr.msrb.gmra.mxu1 %vm129_vm6, %v529_v49 }
 0x701   :  { %975 = vmatpush.bf16.msrb.mxu1 %v1580_v41 }
 0x705   :  { %976 = vmatpush.bf16.msrb.mxu1 %v1586_v43 }
 0x709   :  { %977 = vmatpush.bf16.msrb.mxu1 %v1594_v44 }
 0x70d   :  { %978 = vmatpush.bf16.msrb.mxu1 %v1604_v48 }
 0x710   :  { %v464_v14 = vpop.permute.xlu0 %463 }
 0x711   :  { %v466_v15 = vsel %vm129_vm6, %v461_v10, %v464_v14 }
 0x712   :  { %v467_v16 = vpack.c.bf16 %v466_v15, %v466_v15 }
 0x714   :  { %1290 = vmatmul.msk.bf16.vlgmr.msra.gmra.mxu2 %vm217_vm7, %v467_v16 }
 0x715   :  { %850 = vmatpush.bf16.msra.mxu2 %v1580_v41 }
 0x719   :  { %851 = vmatpush.bf16.msra.mxu2 %v1586_v43 }
 0x71d   :  { %852 = vmatpush.bf16.msra.mxu2 %v1594_v44 }
 0x721   :  { %853 = vmatpush.bf16.msra.mxu2 %v1604_v48 }
 0x77d   :  { %v542_v18 = vpop.f32.mrf.mxu1 }
 0x77e   :  { %v546_v19 = vadd.f32 %v542_v18, %v92_v17 }
 0x780   :  { %1383 = vtanh.f32 %v546_v19  ;;  %v1293_v25 = vmul.f32 -1.442695, %v546_v19 }
 0x785   :  { %v544_v20 = vpop.f32.mrf.mxu1 }
 0x786   :  { %v1384_v11 = vpop.eup %1383 }
 0x787   :  { %569 = vrot.lane.b32.xlu2 %v1384_v11, %s1475_s19 }
 0x797   :  { %v480_v21 = vpop.f32.mrf.mxu2 }
 0x798   :  { %v481_v22 = vadd.f32 %v1639_v58, %v480_v21 }
 0x79a   :  { %1385 = vtanh.f32 %v481_v22  ;;  %v1291_v40 = vmul.f32 -1.442695, %v481_v22 }
 0x79b   :  { %1387 = vpow2.f32 %v1293_v25 }
 0x79f   :  { %v482_v23 = vpop.f32.mrf.mxu2 }
 0x7a0   :  { %v1386_v24 = vpop.eup %1385 }
 0x7a1   :  { %506 = vrot.lane.b32.xlu0 %v1386_v24, %s1475_s19  ;;  %v1388_v26 = vpop.eup %1387 }
 0x7a2   :  { %v550_v27 = vadd.f32 1.0, %v1388_v26 }
 0x7a4   :  { %1389 = vrcp.f32 %v550_v27  ;;  %v562_v32 = vand.u32 2147483648, %v550_v27  ;;  %vm556_vm12 = vweird.f32 %v550_v27  ;;  %v560_v33 = vand.u32 2147483647, %v550_v27 }
 0x7a5   :  { %1391 = vpow2.f32 %v1291_v40 }
 0x7a6   :  { %v563_v35 = vor.u32 1.1754944e-38, %v562_v32  ;;  %vm561_vm14 = vcmp.eq.f32.partialorder %v560_v33, 8.507059e+37 }
 0x7aa   :  { %v1390_v12 = vpop.eup %1389 }
 0x7ab   :  { %v552_v28 = vmul.f32 %v1390_v12, %v550_v27  ;;  %vm557_vm11 = vweird.f32 %v1390_v12  ;;  %v1392_v42 = vpop.eup %1391 }
 0x7ac   :  { %vm558_vm13 = vmor %vm556_vm12, %vm557_vm11  ;;  %v487_v45 = vadd.f32 1.0, %v1392_v42 }
 0x7ad   :  { %v553_v29 = vsub.f32 1.0, %v552_v28 }
 0x7ae   :  { %1393 = vrcp.f32 %v487_v45  ;;  %v499_v54 = vand.u32 2147483648, %v487_v45  ;;  %vm493_vm0 = vweird.f32 %v487_v45  ;;  %v497_v55 = vand.u32 2147483647, %v487_v45 }
 0x7af   :  { %v554_v30 = vmul.f32 %v1390_v12, %v553_v29 }
 0x7b0   :  { %v500_v63 = vor.u32 1.1754944e-38, %v499_v54  ;;  %vm498_vm3 = vcmp.eq.f32.partialorder %v497_v55, 8.507059e+37 }
 0x7b1   :  { %v555_v31 = vadd.f32 %v1390_v12, %v554_v30 }
 0x7b3   :  { %v559_v34 = vsel %vm558_vm13, %v1390_v12, %v555_v31 }
 0x7b4   :  { %v564_v38 = vsel %vm561_vm14, %v563_v35, %v559_v34  ;;  %v1394_v46 = vpop.eup %1393 }
 0x7b5   :  { %v489_v47 = vmul.f32 %v1394_v46, %v487_v45  ;;  %vm494_vm15 = vweird.f32 %v1394_v46  ;;  %v567_v4 = vmul.f32 %v564_v38, %v1683_v62 }
 0x7b6   :  { %vm495_vm2 = vmor %vm493_vm0, %vm494_vm15 }
 0x7b7   :  { %v490_v50 = vsub.f32 1.0, %v489_v47 }
 0x7b9   :  { %v491_v51 = vmul.f32 %v1394_v46, %v490_v50 }
 0x7bb   :  { %v492_v52 = vadd.f32 %v1394_v46, %v491_v51 }
 0x7bd   :  { %v496_v60 = vsel %vm495_vm2, %v1394_v46, %v492_v52 }
 0x7be   :  { %v501_v1 = vsel %vm498_vm3, %v500_v63, %v496_v60 }
 0x7bf   :  { %v504_v49 = vmul.f32 %v501_v1, %v1688_v2 }
 0x7e1   :  { %v570_v36 = vpop.permute.xlu2 %569 }
 0x7e2   :  { %v572_v39 = vmul.f32 %v570_v36, %v564_v38 }
 0x7e4   :  { %574 = vrot.lane.b32.xlu1 %v572_v39, %s1476_s20 }
 0x813   :  { %v507_v37 = vpop.permute.xlu0 %506 }
 0x814   :  { %v509_v3 = vmul.f32 %v507_v37, %v501_v1 }
 0x816   :  { %511 = vrot.lane.b32.xlu2 %v509_v3, %s1476_s20 }
 0x856   :  { %v575_v53 = vpop.permute.xlu1 %574 }
 0x857   :  { %v1717_v6 = vadd.f32 %v575_v53, %v567_v4 }
 0x859   :  { %1395 = vtanh.f32 %v1717_v6 }
 0x85f   :  { %v1396_v7 = vpop.eup %1395 }
 0x860   :  { %580 = vrot.lane.b32.xlu0 %v1396_v7, %s1475_s19 }
 0x870   :  { %v512_v10 = vpop.permute.xlu2 %511 }
 0x871   :  { %v1722_v14 = vadd.f32 %v512_v10, %v504_v49 }
 0x873   :  { %1397 = vtanh.f32 %v1722_v14 }
 0x879   :  { %v1398_v15 = vpop.eup %1397 }
 0x87a   :  { %517 = vrot.lane.b32.xlu1 %v1398_v15, %s1475_s19 }
 0x8d2   :  { %v581_v16 = vpop.permute.xlu0 %580 }
 0x8d3   :  { %v583_v62 = vmul.f32 %v581_v16, %v564_v38 }
 0x8d5   :  { %v651_v17 = vpack.c.bf16 %v583_v62, %v583_v62  ;;  %585 = vrot.lane.b32.xlu0 %v583_v62, %s1476_s20 }
 0x8d7   :  { %653 = vrot.lane.b32.xlu2 %v651_v17, %s1476_s20 }
 0x8ec   :  { %v518_v18 = vpop.permute.xlu1 %517 }
 0x8ed   :  { %v1728_v19 = vmul.f32 %v518_v18, %v501_v1 }
 0x8ef   :  { %588 = vrot.lane.b32.xlu1 %v1728_v19, %s1475_s19 }
 0x931   :  { %v654_v2 = vpop.permute.xlu2 %653 }
 0x932   :  { %1296 = vmatmul.msk.bf16.vlgmr.msrb.gmra.mxu2 %vm129_vm6, %v654_v2 }
 0x933   :  { %1100 = vmatpush.bf16.msrb.mxu2 %v1580_v41  ;;  %v95_v41 = vadd.f32 %v1562_v13, %v1632_v56 }
 0x937   :  { %1101 = vmatpush.bf16.msrb.mxu2 %v1586_v43 }
 0x93b   :  { %1102 = vmatpush.bf16.msrb.mxu2 %v1594_v44 }
 0x93f   :  { %1103 = vmatpush.bf16.msrb.mxu2 %v1604_v48 }
 0x947   :  { %v586_v20 = vpop.permute.xlu0 %585 }
 0x961   :  { %v589_v11 = vpop.permute.xlu1 %588 }
 0x962   :  { %v591_v21 = vsel %vm129_vm6, %v586_v20, %v589_v11 }
 0x963   :  { %v592_v22 = vpack.c.bf16 %v591_v21, %v591_v21 }
 0x965   :  { %1294 = vmatmul.msk.bf16.vlgmr.msrb.gmra.mxu3 %vm217_vm7, %v592_v22 }
 0x966   :  { %1039 = vmatpush.bf16.msrb.mxu3 %v1534_v5 }
 0x96a   :  { %1040 = vmatpush.bf16.msrb.mxu3 %v1546_v9 }
 0x9b5   :  { %v667_v23 = vpop.f32.mrf.mxu2 }
 0x9b6   :  { %v671_v43 = vadd.f32 %v667_v23, %v95_v41  ;;  %v97_v23 = vadd.f32 %v1562_v13, %v1634_v57 }
 0x9b8   :  { %1399 = vtanh.f32 %v671_v43  ;;  %v1297_v26 = vmul.f32 -1.442695, %v671_v43 }
 0x9bd   :  { %v669_v44 = vpop.f32.mrf.mxu2 }
 0x9be   :  { %v1400_v24 = vpop.eup %1399 }
 0x9bf   :  { %694 = vrot.lane.b32.xlu2 %v1400_v24, %s1475_s19 }
 0x9e8   :  { %v605_v48 = vpop.f32.mrf.mxu3 }
 0x9e9   :  { %v606_v25 = vadd.f32 %v1639_v58, %v605_v48 }
 0x9eb   :  { %1401 = vtanh.f32 %v606_v25  ;;  %v1295_v40 = vmul.f32 -1.442695, %v606_v25 }
 0x9ec   :  { %1403 = vpow2.f32 %v1297_v26 }
 0x9f0   :  { %v607_v27 = vpop.f32.mrf.mxu3 }
 0x9f1   :  { %v1402_v5 = vpop.eup %1401 }
 0x9f2   :  { %631 = vrot.lane.b32.xlu0 %v1402_v5, %s1475_s19  ;;  %v1404_v9 = vpop.eup %1403 }
 0x9f3   :  { %v675_v12 = vadd.f32 1.0, %v1404_v9 }
 0x9f5   :  { %1405 = vrcp.f32 %v675_v12  ;;  %v687_v32 = vand.u32 2147483648, %v675_v12  ;;  %vm681_vm5 = vweird.f32 %v675_v12  ;;  %v685_v33 = vand.u32 2147483647, %v675_v12 }
 0x9f6   :  { %1407 = vpow2.f32 %v1295_v40 }
 0x9f7   :  { %v688_v35 = vor.u32 1.1754944e-38, %v687_v32  ;;  %vm686_vm9 = vcmp.eq.f32.partialorder %v685_v33, 8.507059e+37 }
 0x9fb   :  { %v1406_v56 = vpop.eup %1405 }
 0x9fc   :  { %v677_v28 = vmul.f32 %v1406_v56, %v675_v12  ;;  %vm682_vm4 = vweird.f32 %v1406_v56  ;;  %v1408_v42 = vpop.eup %1407 }
 0x9fd   :  { %vm683_vm8 = vmor %vm681_vm5, %vm682_vm4  ;;  %v612_v45 = vadd.f32 1.0, %v1408_v42 }
 0x9fe   :  { %v678_v29 = vsub.f32 1.0, %v677_v28 }
 0x9ff   :  { %1409 = vrcp.f32 %v612_v45  ;;  %v624_v54 = vand.u32 2147483648, %v612_v45  ;;  %vm618_vm11 = vweird.f32 %v612_v45  ;;  %v622_v55 = vand.u32 2147483647, %v612_v45 }
 0xa00   :  { %v679_v30 = vmul.f32 %v1406_v56, %v678_v29 }
 0xa01   :  { %v625_v63 = vor.u32 1.1754944e-38, %v624_v54  ;;  %vm623_vm13 = vcmp.eq.f32.partialorder %v622_v55, 8.507059e+37 }
 0xa02   :  { %v680_v31 = vadd.f32 %v1406_v56, %v679_v30 }
 0xa04   :  { %v684_v34 = vsel %vm683_vm8, %v1406_v56, %v680_v31 }
 0xa05   :  { %v689_v38 = vsel %vm686_vm9, %v688_v35, %v684_v34  ;;  %v1410_v46 = vpop.eup %1409 }
 0xa06   :  { %v614_v47 = vmul.f32 %v1410_v46, %v612_v45  ;;  %vm619_vm10 = vweird.f32 %v1410_v46  ;;  %v692_v4 = vmul.f32 %v689_v38, %v1717_v6 }
 0xa07   :  { %vm620_vm12 = vmor %vm618_vm11, %vm619_vm10 }
 0xa08   :  { %v615_v50 = vsub.f32 1.0, %v614_v47 }
 0xa0a   :  { %v616_v51 = vmul.f32 %v1410_v46, %v615_v50 }
 0xa0c   :  { %v617_v52 = vadd.f32 %v1410_v46, %v616_v51 }
 0xa0e   :  { %v621_v60 = vsel %vm620_vm12, %v1410_v46, %v617_v52 }
 0xa0f   :  { %v626_v1 = vsel %vm623_vm13, %v625_v63, %v621_v60 }
 0xa10   :  { %v629_v10 = vmul.f32 %v626_v1, %v1722_v14 }
 0xa19   :  { %v695_v36 = vpop.permute.xlu2 %694 }
 0xa1a   :  { %v697_v39 = vmul.f32 %v695_v36, %v689_v38 }
 0xa1c   :  { %699 = vrot.lane.b32.xlu1 %v697_v39, %s1476_s20 }
 0xa64   :  { %v632_v37 = vpop.permute.xlu0 %631 }
 0xa65   :  { %v634_v3 = vmul.f32 %v632_v37, %v626_v1 }
 0xa67   :  { %636 = vrot.lane.b32.xlu2 %v634_v3, %s1476_s20 }
 0xa8e   :  { %v700_v53 = vpop.permute.xlu1 %699 }
 0xa8f   :  { %v1749_v7 = vadd.f32 %v700_v53, %v692_v4 }
 0xa91   :  { %1411 = vtanh.f32 %v1749_v7 }
 0xa97   :  { %v1412_v49 = vpop.eup %1411 }
 0xa98   :  { %705 = vrot.lane.b32.xlu0 %v1412_v49, %s1475_s19 }
 0xac1   :  { %v637_v15 = vpop.permute.xlu2 %636 }
 0xac2   :  { %v1754_v16 = vadd.f32 %v637_v15, %v629_v10 }
 0xac4   :  { %1413 = vtanh.f32 %v1754_v16 }
 0xaca   :  { %v1414_v62 = vpop.eup %1413 }
 0xacb   :  { %642 = vrot.lane.b32.xlu1 %v1414_v62, %s1475_s19 }
 0xb0a   :  { %v706_v17 = vpop.permute.xlu0 %705 }
 0xb0b   :  { %v708_v6 = vmul.f32 %v706_v17, %v689_v38 }
 0xb0d   :  { %v776_v18 = vpack.c.bf16 %v708_v6, %v708_v6  ;;  %710 = vrot.lane.b32.xlu0 %v708_v6, %s1476_s20 }
 0xb0f   :  { %778 = vrot.lane.b32.xlu2 %v776_v18, %s1476_s20 }
 0xb3d   :  { %v643_v2 = vpop.permute.xlu1 %642 }
 0xb3e   :  { %v1760_v20 = vmul.f32 %v643_v2, %v626_v1 }
 0xb40   :  { %713 = vrot.lane.b32.xlu1 %v1760_v20, %s1475_s19 }
 0xb69   :  { %v779_v14 = vpop.permute.xlu2 %778 }
 0xb6a   :  { %1300 = vmatmul.msk.bf16.vlgmr.msra.gmra.mxu3 %vm129_vm6, %v779_v14 }
 0xb7f   :  { %v711_v11 = vpop.permute.xlu0 %710 }
 0xbb2   :  { %v714_v21 = vpop.permute.xlu1 %713 }
 0xbb3   :  { %v716_v22 = vsel %vm129_vm6, %v711_v11, %v714_v21 }
 0xbb4   :  { %v717_v41 = vpack.c.bf16 %v716_v22, %v716_v22 }
 0xbb6   :  { %1298 = vmatmul.msk.bf16.vlgmr.msra.gmra.mxu1 %vm217_vm7, %v717_v41 }
 0xbed   :  { %v792_v43 = vpop.f32.mrf.mxu3 }
 0xbee   :  { %v796_v44 = vadd.f32 %v792_v43, %v97_v23  ;;  %v1796_v23 = vld [vmem:[%s1925_s3] ss:$0 sm:$0xff] }
 0xbef   :  { %v100_v43 = vadd.f32 %v1796_v23, %v1642_v61 }
 0xbf0   :  { %1415 = vtanh.f32 %v796_v44  ;;  %v1301_v9 = vmul.f32 -1.442695, %v796_v44 }
 0xbf5   :  { %v794_v24 = vpop.f32.mrf.mxu3 }
 0xbf6   :  { %v1416_v48 = vpop.eup %1415 }
 0xbf7   :  { %819 = vrot.lane.b32.xlu0 %v1416_v48, %s1475_s19 }
 0xc33   :  { %v730_v25 = vpop.f32.mrf.mxu1 }
 0xc34   :  { %v731_v26 = vadd.f32 %v1639_v58, %v730_v25 }
 0xc36   :  { %1417 = vtanh.f32 %v731_v26  ;;  %v1299_v38 = vmul.f32 -1.442695, %v731_v26 }
 0xc37   :  { %1419 = vpow2.f32 %v1301_v9 }
 0xc3b   :  { %v732_v27 = vpop.f32.mrf.mxu1 }
 0xc3c   :  { %v1418_v5 = vpop.eup %1417 }
 0xc3d   :  { %756 = vrot.lane.b32.xlu2 %v1418_v5, %s1475_s19  ;;  %v1420_v12 = vpop.eup %1419 }
 0xc3e   :  { %v800_v56 = vadd.f32 1.0, %v1420_v12 }
 0xc40   :  { %1421 = vrcp.f32 %v800_v56  ;;  %v812_v31 = vand.u32 2147483648, %v800_v56  ;;  %vm806_vm15 = vweird.f32 %v800_v56  ;;  %v810_v32 = vand.u32 2147483647, %v800_v56 }
 0xc41   :  { %1423 = vpow2.f32 %v1299_v38 }
 0xc42   :  { %v813_v34 = vor.u32 1.1754944e-38, %v812_v31  ;;  %vm811_vm2 = vcmp.eq.f32.partialorder %v810_v32, 8.507059e+37 }
 0xc46   :  { %v1422_v13 = vpop.eup %1421 }
 0xc47   :  { %v802_v57 = vmul.f32 %v1422_v13, %v800_v56  ;;  %vm807_vm14 = vweird.f32 %v1422_v13  ;;  %v1424_v40 = vpop.eup %1423 }
 0xc48   :  { %vm808_vm0 = vmor %vm806_vm15, %vm807_vm14  ;;  %v737_v42 = vadd.f32 1.0, %v1424_v40 }
 0xc49   :  { %v803_v28 = vsub.f32 1.0, %v802_v57 }
 0xc4a   :  { %1425 = vrcp.f32 %v737_v42  ;;  %v749_v52 = vand.u32 2147483648, %v737_v42  ;;  %vm743_vm4 = vweird.f32 %v737_v42  ;;  %v747_v54 = vand.u32 2147483647, %v737_v42 }
 0xc4b   :  { %v804_v29 = vmul.f32 %v1422_v13, %v803_v28 }
 0xc4c   :  { %v750_v60 = vor.u32 1.1754944e-38, %v749_v52  ;;  %vm748_vm8 = vcmp.eq.f32.partialorder %v747_v54, 8.507059e+37 }
 0xc4d   :  { %v805_v30 = vadd.f32 %v1422_v13, %v804_v29 }
 0xc4f   :  { %v809_v33 = vsel %vm808_vm0, %v1422_v13, %v805_v30 }
 0xc50   :  { %v814_v36 = vsel %vm811_vm2, %v813_v34, %v809_v33  ;;  %v1426_v45 = vpop.eup %1425 }
 0xc51   :  { %v739_v46 = vmul.f32 %v1426_v45, %v737_v42  ;;  %vm744_vm3 = vweird.f32 %v1426_v45  ;;  %v817_v3 = vmul.f32 %v814_v36, %v1749_v7 }
 0xc52   :  { %vm745_vm5 = vmor %vm743_vm4, %vm744_vm3 }
 0xc53   :  { %v740_v47 = vsub.f32 1.0, %v739_v46 }
 0xc55   :  { %v741_v50 = vmul.f32 %v1426_v45, %v740_v47 }
 0xc57   :  { %v742_v51 = vadd.f32 %v1426_v45, %v741_v50 }
 0xc59   :  { %v746_v55 = vsel %vm745_vm5, %v1426_v45, %v742_v51 }
 0xc5a   :  { %v751_v37 = vsel %vm748_vm8, %v750_v60, %v746_v55 }
 0xc5b   :  { %v754_v10 = vmul.f32 %v751_v37, %v1754_v16 }
 0xc69   :  { %v820_v35 = vpop.permute.xlu0 %819 }
 0xc6a   :  { %v822_v39 = vmul.f32 %v820_v35, %v814_v36 }
 0xc6c   :  { %824 = vrot.lane.b32.xlu2 %v822_v39, %s1476_s20 }
 0xc97   :  { %v757_v63 = vpop.permute.xlu2 %756 }
 0xc98   :  { %v759_v1 = vmul.f32 %v757_v63, %v751_v37 }
 0xc9a   :  { %761 = vrot.lane.b32.xlu1 %v759_v1, %s1476_s20 }
 0xcc6   :  { %v825_v4 = vpop.permute.xlu2 %824 }
 0xcc7   :  { %v1775_v53 = vadd.f32 %v825_v4, %v817_v3 }
 0xcc9   :  { %1427 = vtanh.f32 %v1775_v53 }
 0xccf   :  { %v1428_v49 = vpop.eup %1427 }
 0xcd0   :  { %830 = vrot.lane.b32.xlu1 %v1428_v49, %s1475_s19 }
 0xd0c   :  { %v762_v15 = vpop.permute.xlu1 %761 }
 0xd0d   :  { %v1780_v62 = vadd.f32 %v762_v15, %v754_v10 }
 0xd0f   :  { %1429 = vtanh.f32 %v1780_v62 }
 0xd15   :  { %v1430_v17 = vpop.eup %1429 }
 0xd16   :  { %767 = vrot.lane.b32.xlu0 %v1430_v17, %s1475_s19 }
 0xd42   :  { %v831_v6 = vpop.permute.xlu1 %830 }
 0xd43   :  { %v833_v7 = vmul.f32 %v831_v6, %v814_v36 }
 0xd45   :  { %v901_v18 = vpack.c.bf16 %v833_v7, %v833_v7  ;;  %835 = vrot.lane.b32.xlu2 %v833_v7, %s1476_s20 }
 0xd47   :  { %903 = vrot.lane.b32.xlu1 %v901_v18, %s1476_s20 }
 0xd88   :  { %v768_v2 = vpop.permute.xlu0 %767 }
 0xd89   :  { %v1786_v14 = vmul.f32 %v768_v2, %v751_v37 }
 0xd8b   :  { %838 = vrot.lane.b32.xlu0 %v1786_v14, %s1475_s19 }
 0xd9f   :  { %v836_v11 = vpop.permute.xlu2 %835 }
 0xdb9   :  { %v904_v16 = vpop.permute.xlu1 %903 }
 0xdba   :  { %1304 = vmatmul.msk.bf16.vlgmr.msrb.gmra.mxu0 %vm129_vm6, %v904_v16 }
 0xdfd   :  { %v839_v21 = vpop.permute.xlu0 %838 }
 0xdfe   :  { %v841_v22 = vsel %vm129_vm6, %v836_v11, %v839_v21 }
 0xdff   :  { %v842_v41 = vpack.c.bf16 %v841_v22, %v841_v22 }
 0xe01   :  { %1302 = vmatmul.msk.bf16.vlgmr.msra.gmra.mxu2 %vm217_vm7, %v842_v41 }
 0xe37   :  { %v917_v44 = vpop.f32.mrf.mxu0 }
 0xe38   :  { %v921_v24 = vadd.f32 %v917_v44, %v100_v43  ;;  %v102_v43 = vadd.f32 %v1796_v23, %v1645_v0 }
 0xe3a   :  { %1431 = vtanh.f32 %v921_v24  ;;  %v1305_v26 = vmul.f32 -1.442695, %v921_v24 }
 0xe3c   :  { %1433 = vpow2.f32 %v1305_v26 }
 0xe3f   :  { %v919_v48 = vpop.f32.mrf.mxu0 }
 0xe40   :  { %v1432_v25 = vpop.eup %1431 }
 0xe41   :  { %944 = vrot.lane.b32.xlu2 %v1432_v25, %s1475_s19 }
 0xe42   :  { %v1434_v27 = vpop.eup %1433 }
 0xe43   :  { %v925_v5 = vadd.f32 1.0, %v1434_v27 }
 0xe45   :  { %1435 = vrcp.f32 %v925_v5  ;;  %v937_v31 = vand.u32 2147483648, %v925_v5  ;;  %vm931_vm10 = vweird.f32 %v925_v5  ;;  %v935_v32 = vand.u32 2147483647, %v925_v5 }
 0xe47   :  { %v938_v34 = vor.u32 1.1754944e-38, %v937_v31  ;;  %vm936_vm12 = vcmp.eq.f32.partialorder %v935_v32, 8.507059e+37 }
 0xe4b   :  { %v1436_v12 = vpop.eup %1435 }
 0xe4c   :  { %v927_v13 = vmul.f32 %v1436_v12, %v925_v5  ;;  %vm932_vm9 = vweird.f32 %v1436_v12 }
 0xe4d   :  { %vm933_vm11 = vmor %vm931_vm10, %vm932_vm9 }
 0xe4e   :  { %v928_v61 = vsub.f32 1.0, %v927_v13 }
 0xe50   :  { %v929_v29 = vmul.f32 %v1436_v12, %v928_v61 }
 0xe52   :  { %v930_v30 = vadd.f32 %v1436_v12, %v929_v29 }
 0xe54   :  { %v934_v33 = vsel %vm933_vm11, %v1436_v12, %v930_v30  ;;  %v1830_v12 = vld [vmem:[%s1927_s5] ss:$0 sm:$0xff] }
 0xe55   :  { %v939_v36 = vsel %vm936_vm12, %v938_v34, %v934_v33  ;;  %vm38_vm12 = vcmask 60416  }
 0xe56   :  { %v942_v1 = vmul.f32 %v939_v36, %v1775_v53 }
 0xe84   :  { %v855_v9 = vpop.f32.mrf.mxu2 }
 0xe85   :  { %v856_v56 = vadd.f32 %v1639_v58, %v855_v9 }
 0xe87   :  { %1437 = vtanh.f32 %v856_v56  ;;  %v1303_v38 = vmul.f32 -1.442695, %v856_v56 }
 0xe89   :  { %1439 = vpow2.f32 %v1303_v38 }
 0xe8c   :  { %v857_v57 = vpop.f32.mrf.mxu2 }
 0xe8d   :  { %v1438_v28 = vpop.eup %1437 }
 0xe8e   :  { %881 = vrot.lane.b32.xlu0 %v1438_v28, %s1475_s19 }
 0xe8f   :  { %v1440_v39 = vpop.eup %1439 }
 0xe90   :  { %v862_v40 = vadd.f32 1.0, %v1440_v39 }
 0xe92   :  { %1441 = vrcp.f32 %v862_v40  ;;  %v874_v51 = vand.u32 2147483648, %v862_v40  ;;  %vm868_vm14 = vweird.f32 %v862_v40  ;;  %v872_v52 = vand.u32 2147483647, %v862_v40 }
 0xe94   :  { %v875_v55 = vor.u32 1.1754944e-38, %v874_v51  ;;  %vm873_vm0 = vcmp.eq.f32.partialorder %v872_v52, 8.507059e+37 }
 0xe98   :  { %v1442_v42 = vpop.eup %1441 }
 0xe99   :  { %v864_v45 = vmul.f32 %v1442_v42, %v862_v40  ;;  %vm869_vm13 = vweird.f32 %v1442_v42 }
 0xe9a   :  { %vm870_vm15 = vmor %vm868_vm14, %vm869_vm13 }
 0xe9b   :  { %v945_v35 = vpop.permute.xlu2 %944  ;;  %v865_v46 = vsub.f32 1.0, %v864_v45 }
 0xe9c   :  { %v947_v58 = vmul.f32 %v945_v35, %v939_v36 }
 0xe9d   :  { %v866_v47 = vmul.f32 %v1442_v42, %v865_v46 }
 0xe9e   :  { %949 = vrot.lane.b32.xlu1 %v947_v58, %s1476_s20 }
 0xe9f   :  { %v867_v50 = vadd.f32 %v1442_v42, %v866_v47 }
 0xea1   :  { %v871_v54 = vsel %vm870_vm15, %v1442_v42, %v867_v50 }
 0xea2   :  { %v876_v63 = vsel %vm873_vm0, %v875_v55, %v871_v54 }
 0xea3   :  { %v879_v10 = vmul.f32 %v876_v63, %v1780_v62 }
 0xf00   :  { %v882_v60 = vpop.permute.xlu0 %881 }
 0xf01   :  { %v884_v37 = vmul.f32 %v882_v60, %v876_v63 }
 0xf03   :  { %886 = vrot.lane.b32.xlu2 %v884_v37, %s1476_s20 }
 0xf10   :  { %v950_v3 = vpop.permute.xlu1 %949 }
 0xf11   :  { %v1806_v4 = vadd.f32 %v950_v3, %v942_v1 }
 0xf13   :  { %1443 = vtanh.f32 %v1806_v4 }
 0xf19   :  { %v1444_v49 = vpop.eup %1443 }
 0xf1a   :  { %955 = vrot.lane.b32.xlu0 %v1444_v49, %s1475_s19 }
 0xf5d   :  { %v887_v15 = vpop.permute.xlu2 %886 }
 0xf5e   :  { %v1811_v17 = vadd.f32 %v887_v15, %v879_v10 }
 0xf60   :  { %1445 = vtanh.f32 %v1811_v17 }
 0xf66   :  { %v1446_v6 = vpop.eup %1445 }
 0xf67   :  { %892 = vrot.lane.b32.xlu1 %v1446_v6, %s1475_s19 }
 0xf8c   :  { %v956_v7 = vpop.permute.xlu0 %955 }
 0xf8d   :  { %v958_v53 = vmul.f32 %v956_v7, %v939_v36 }
 0xf8f   :  { %v1026_v18 = vpack.c.bf16 %v958_v53, %v958_v53  ;;  %960 = vrot.lane.b32.xlu0 %v958_v53, %s1476_s20 }
 0xf91   :  { %1028 = vrot.lane.b32.xlu2 %v1026_v18, %s1476_s20 }
 0xfd9   :  { %v893_v2 = vpop.permute.xlu1 %892 }
 0xfda   :  { %v1817_v16 = vmul.f32 %v893_v2, %v876_v63 }
 0xfdc   :  { %963 = vrot.lane.b32.xlu1 %v1817_v16, %s1475_s19 }
 0xfeb   :  { %v1029_v62 = vpop.permute.xlu2 %1028 }
 0xfec   :  { %1308 = vmatmul.msk.bf16.vlgmr.msrb.gmra.mxu3 %vm129_vm6, %v1029_v62 }
0x1001   :  { %v961_v11 = vpop.permute.xlu0 %960 }
0x104e   :  { %v964_v21 = vpop.permute.xlu1 %963 }
0x104f   :  { %v966_v22 = vsel %vm129_vm6, %v961_v11, %v964_v21 }
0x1050   :  { %v967_v41 = vpack.c.bf16 %v966_v22, %v966_v22 }
0x1052   :  { %1306 = vmatmul.msk.bf16.vlgmr.msrb.gmra.mxu1 %vm217_vm7, %v967_v41 }
0x106f   :  { %v1042_v44 = vpop.f32.mrf.mxu3 }
0x1070   :  { %v1046_v24 = vadd.f32 %v1042_v44, %v102_v43 }
0x1072   :  { %1447 = vtanh.f32 %v1046_v24  ;;  %v1309_v26 = vmul.f32 -1.442695, %v1046_v24 }
0x1074   :  { %1449 = vpow2.f32 %v1309_v26 }
0x1077   :  { %v1044_v48 = vpop.f32.mrf.mxu3 }
0x1078   :  { %v1448_v25 = vpop.eup %1447 }
0x1079   :  { %1069 = vrot.lane.b32.xlu0 %v1448_v25, %s1475_s19 }
0x107a   :  { %v1450_v27 = vpop.eup %1449 }
0x107b   :  { %v1050_v5 = vadd.f32 1.0, %v1450_v27 }
0x107d   :  { %1451 = vrcp.f32 %v1050_v5  ;;  %v1062_v30 = vand.u32 2147483648, %v1050_v5  ;;  %vm1056_vm3 = vweird.f32 %v1050_v5  ;;  %v1060_v31 = vand.u32 2147483647, %v1050_v5 }
0x107f   :  { %v1063_v33 = vor.u32 1.1754944e-38, %v1062_v30  ;;  %vm1061_vm5 = vcmp.eq.f32.partialorder %v1060_v31, 8.507059e+37 }
0x1083   :  { %v1452_v23 = vpop.eup %1451 }
0x1084   :  { %v1052_v57 = vmul.f32 %v1452_v23, %v1050_v5  ;;  %vm1057_vm2 = vweird.f32 %v1452_v23  ;;  %v1331_v5 = vld [vmem:[%s1928_s6 + $0x8] sm:$0xff] }
0x1085   :  { %vm1058_vm4 = vmor %vm1056_vm3, %vm1057_vm2  ;;  %1201 = vmatpush.bf16.msra.mxu0 %v1331_v5 }
0x1086   :  { %v1053_v61 = vsub.f32 1.0, %v1052_v57 }
0x1088   :  { %v1054_v28 = vmul.f32 %v1452_v23, %v1053_v61 }
0x108a   :  { %v1055_v29 = vadd.f32 %v1452_v23, %v1054_v28 }
0x108c   :  { %v1059_v32 = vsel %vm1058_vm4, %v1452_v23, %v1055_v29 }
0x108d   :  { %v1064_v35 = vsel %vm1061_vm5, %v1063_v33, %v1059_v32 }
0x108e   :  { %v1067_v37 = vmul.f32 %v1064_v35, %v1806_v4 }
0x10cf   :  { %v980_v9 = vpop.f32.mrf.mxu1 }
0x10d0   :  { %v981_v0 = vadd.f32 %v1830_v12, %v980_v9 }
0x10d2   :  { %1453 = vtanh.f32 %v981_v0  ;;  %v1307_v58 = vmul.f32 -1.442695, %v981_v0 }
0x10d4   :  { %1455 = vpow2.f32 %v1307_v58 }
0x10d7   :  { %v982_v56 = vpop.f32.mrf.mxu1 }
0x10d8   :  { %v1454_v13 = vpop.eup %1453 }
0x10d9   :  { %1006 = vrot.lane.b32.xlu2 %v1454_v13, %s1475_s19 }
0x10da   :  { %v1456_v38 = vpop.eup %1455 }
0x10db   :  { %v987_v39 = vadd.f32 1.0, %v1456_v38 }
0x10dd   :  { %1457 = vrcp.f32 %v987_v39  ;;  %v999_v50 = vand.u32 2147483648, %v987_v39  ;;  %vm993_vm9 = vweird.f32 %v987_v39  ;;  %v997_v51 = vand.u32 2147483647, %v987_v39 }
0x10df   :  { %v1000_v54 = vor.u32 1.1754944e-38, %v999_v50  ;;  %vm998_vm11 = vcmp.eq.f32.partialorder %v997_v51, 8.507059e+37 }
0x10e3   :  { %v1458_v40 = vpop.eup %1457 }
0x10e4   :  { %v989_v42 = vmul.f32 %v1458_v40, %v987_v39  ;;  %vm994_vm8 = vweird.f32 %v1458_v40 }
0x10e5   :  { %vm995_vm10 = vmor %vm993_vm9, %vm994_vm8 }
0x10e6   :  { %v990_v45 = vsub.f32 1.0, %v989_v42 }
0x10e8   :  { %v991_v46 = vmul.f32 %v1458_v40, %v990_v45 }
0x10ea   :  { %v992_v47 = vadd.f32 %v1458_v40, %v991_v46 }
0x10eb   :  { %v1070_v34 = vpop.permute.xlu0 %1069 }
0x10ec   :  { %v1072_v36 = vmul.f32 %v1070_v34, %v1064_v35  ;;  %v996_v52 = vsel %vm995_vm10, %v1458_v40, %v992_v47 }
0x10ed   :  { %v1001_v60 = vsel %vm998_vm11, %v1000_v54, %v996_v52 }
0x10ee   :  { %1074 = vrot.lane.b32.xlu2 %v1072_v36, %s1476_s20  ;;  %v1004_v10 = vmul.f32 %v1001_v60, %v1811_v17 }
0x1133   :  { %v1007_v55 = vpop.permute.xlu2 %1006 }
0x1134   :  { %v1009_v63 = vmul.f32 %v1007_v55, %v1001_v60 }
0x1136   :  { %1011 = vrot.lane.b32.xlu1 %v1009_v63, %s1476_s20  ;;  %v1342_v63 = vld [vmem:[%s1929_s7] ss:$0 sm:$0xff] }
0x1148   :  { %v1075_v1 = vpop.permute.xlu2 %1074 }
0x1149   :  { %v1077_v3 = vadd.f32 %v1075_v1, %v1067_v37 }
0x114b   :  { %1459 = vtanh.f32 %v1077_v3 }
0x1151   :  { %v1460_v49 = vpop.eup %1459 }
0x1152   :  { %1080 = vrot.lane.b32.xlu1 %v1460_v49, %s1475_s19 }
0x11a8   :  { %v1012_v15 = vpop.permute.xlu1 %1011 }
0x11a9   :  { %v1839_v6 = vadd.f32 %v1012_v15, %v1004_v10 }
0x11ab   :  { %1461 = vtanh.f32 %v1839_v6 }
0x11b1   :  { %v1462_v7 = vpop.eup %1461 }
0x11b2   :  { %1017 = vrot.lane.b32.xlu0 %v1462_v7, %s1475_s19 }
0x11c4   :  { %v1081_v53 = vpop.permute.xlu1 %1080 }
0x11c5   :  { %v1083_v18 = vmul.f32 %v1081_v53, %v1064_v35 }
0x11c7   :  { %1085 = vrot.lane.b32.xlu2 %v1083_v18, %s1476_s20 }
0x1221   :  { %v1086_v17 = vpop.permute.xlu2 %1085 }
0x1224   :  { %v1018_v4 = vpop.permute.xlu0 %1017 }
0x1225   :  { %v1020_v2 = vmul.f32 %v1018_v4, %v1001_v60 }
0x1227   :  { %1088 = vrot.lane.b32.xlu0 %v1020_v2, %s1475_s19 }
0x122f   :  { %272 = vrot.lane.b32.xlu0 %v1660_v59, %s1476_s20 }
0x1237   :  { %522 = vrot.lane.b32.xlu0 %v1728_v19, %s1476_s20 }
0x123f   :  { %897 = vrot.lane.b32.xlu0 %v1817_v16, %s1476_s20  ;;  %v1473_v16 = vld [vmem:[%s1923_s0 + $0x38] sm:$0xff] }
0x1240   :  { %v39_v44 = vsel %vm38_vm12, %v1473_v16, -inf }
0x1269   :  { %40 = vmax.xlane.f32.xlu0 %v39_v44 }
0x1299   :  { %v1089_v62 = vpop.permute.xlu0 %1088 }
0x129a   :  { %v1091_v11 = vsel %vm129_vm6, %v1086_v17, %v1089_v62 }
0x129b   :  { %v1092_v21 = vpack.c.bf16 %v1091_v11, %v1091_v11 }
0x129d   :  { %1310 = vmatmul.msk.bf16.vlgmr.msrb.gmra.mxu2 %vm217_vm7, %v1092_v21 }
0x12a1   :  { %v273_v22 = vpop.permute.xlu0 %272 }
0x12a2   :  { %275 = vst.msk [vmem:[#allocation2] sm:$0xff] %vm129_vm6, %v273_v22 }
0x12a9   :  { %v523_v41 = vpop.permute.xlu0 %522  ;;  %v1151_v33 = vld [vmem:[#allocation2] sm:$0xff] }
0x12aa   :  { %525 = vst.msk [vmem:[#allocation2 + $0x10] sm:$0xff] %vm129_vm6, %v523_v41 }
0x12b1   :  { %v898_v59 = vpop.permute.xlu0 %897  ;;  %v1153_v38 = vld [vmem:[#allocation2 + $0x10] sm:$0xff] }
0x12b2   :  { %900 = vst.msk [vmem:[#allocation2 + $0x28] sm:$0xff] %vm129_vm6, %v898_v59 }
0x12dc   :  { %v41_v40 = vpop.xlane.xlu0 %40 }
0x12dd   :  { %v42_v42 = vrot.slane %v41_v40, 4 }
0x12df   :  { %v43_v45 = vmax.f32 %v41_v40, %v42_v42 }
0x12e1   :  { %v44_v46 = vrot.slane %v43_v45, 2 }
0x12e3   :  { %v45_v47 = vmax.f32 %v43_v45, %v44_v46 }
0x12e5   :  { %v46_v50 = vrot.slane %v45_v47, 1 }
0x12e7   :  { %v47_v51 = vmax.f32 %v45_v47, %v46_v50 }
0x12e9   :  { %1335 = vpush %v47_v51 }
0x131a   :  { %s1336_s24 = spop %1335 }
0x131b   :  { %v1232_v3 = vstv %s1336_s24 }
0x1320   :  { %v1105_v19 = vpop.f32.mrf.mxu2 }
0x1321   :  { %v1106_v43 = vadd.f32 %v1830_v12, %v1105_v19 }
0x1323   :  { %1463 = vtanh.f32 %v1106_v43  ;;  %v1311_v25 = vmul.f32 -1.442695, %v1106_v43  ;;  %v1156_v43 = vld [vmem:[#allocation2 + $0x28] sm:$0xff] }
0x1325   :  { %1465 = vpow2.f32 %v1311_v25 }
0x1328   :  { %v1107_v24 = vpop.f32.mrf.mxu2 }
0x1329   :  { %v1464_v48 = vpop.eup %1463 }
0x132a   :  { %1131 = vrot.lane.b32.xlu1 %v1464_v48, %s1475_s19 }
0x132b   :  { %v1466_v26 = vpop.eup %1465 }
0x132c   :  { %v1112_v27 = vadd.f32 1.0, %v1466_v26 }
0x132e   :  { %1467 = vrcp.f32 %v1112_v27  ;;  %v1124_v56 = vand.u32 2147483648, %v1112_v27  ;;  %vm1118_vm13 = vweird.f32 %v1112_v27  ;;  %v1122_v13 = vand.u32 2147483647, %v1112_v27 }
0x1330   :  { %v1125_v61 = vor.u32 1.1754944e-38, %v1124_v56  ;;  %vm1123_vm15 = vcmp.eq.f32.partialorder %v1122_v13, 8.507059e+37 }
0x1332   :  { %397 = vrot.lane.b32.xlu1 %v1694_v8, %s1476_s20  ;;  %v1330_v8 = vld [vmem:[%s1928_s6] sm:$0xff] }
0x1333   :  { %1202 = vmatpush.bf16.msra.mxu0 %v1330_v8 }
0x1334   :  { %v1468_v9 = vpop.eup %1467 }
0x1335   :  { %v1114_v12 = vmul.f32 %v1468_v9, %v1112_v27  ;;  %vm1119_vm7 = vweird.f32 %v1468_v9 }
0x1336   :  { %vm1120_vm14 = vmor %vm1118_vm13, %vm1119_vm7 }
0x133a   :  { %647 = vrot.lane.b32.xlu1 %v1760_v20, %s1476_s20  ;;  %v1115_v20 = vsub.f32 1.0, %v1114_v12 }
0x133c   :  { %v1116_v0 = vmul.f32 %v1468_v9, %v1115_v20 }
0x133e   :  { %v1117_v23 = vadd.f32 %v1468_v9, %v1116_v0 }
0x1340   :  { %v1121_v57 = vsel %vm1120_vm14, %v1468_v9, %v1117_v23 }
0x1341   :  { %v1126_v29 = vsel %vm1123_vm15, %v1125_v61, %v1121_v57 }
0x1342   :  { %1022 = vrot.lane.b32.xlu1 %v1020_v2, %s1476_s20  ;;  %v1129_v52 = vmul.f32 %v1126_v29, %v1839_v6 }
0x139c   :  { %v1132_v28 = vpop.permute.xlu1 %1131 }
0x139d   :  { %v1134_v30 = vmul.f32 %v1132_v28, %v1126_v29 }
0x139f   :  { %1136 = vrot.lane.b32.xlu2 %v1134_v30, %s1476_s20 }
0x13a4   :  { %v398_v31 = vpop.permute.xlu1 %397 }
0x13a5   :  { %400 = vst.msk [vmem:[#allocation2 + $0x8] sm:$0xff] %vm129_vm6, %v398_v31 }
0x13ac   :  { %v648_v32 = vpop.permute.xlu1 %647  ;;  %v1152_v34 = vld [vmem:[#allocation2 + $0x8] sm:$0xff] }
0x13ad   :  { %650 = vst.msk [vmem:[#allocation2 + $0x18] sm:$0xff] %vm129_vm6, %v648_v32  ;;  %v1159_v35 = vpack.c.bf16 %v1152_v34, %v1151_v33 }
0x13af   :  { %1320 = vmatmul.msk.bf16.vlgmr.msra.gmra.mxu0 %vm129_vm6, %v1159_v35 }
0x13b4   :  { %v1023_v36 = vpop.permute.xlu1 %1022  ;;  %v1154_v58 = vld [vmem:[#allocation2 + $0x18] sm:$0xff] }
0x13b5   :  { %1025 = vst.msk [vmem:[#allocation2 + $0x30] sm:$0xff] %vm129_vm6, %v1023_v36  ;;  %v1160_v39 = vpack.c.bf16 %v1154_v58, %v1153_v38 }
0x13bc   :  { %v1157_v24 = vld [vmem:[#allocation2 + $0x30] sm:$0xff] }
0x13bf   :  { %1321 = vmatmul.msk.bf16.gmra.mxu0 %vm129_vm6, %v1160_v39 }
0x13f9   :  { %v1137_v54 = vpop.permute.xlu2 %1136 }
0x13fa   :  { %v1139_v55 = vadd.f32 %v1137_v54, %v1129_v52 }
0x13fc   :  { %1469 = vtanh.f32 %v1139_v55 }
0x1402   :  { %v1470_v60 = vpop.eup %1469 }
0x1403   :  { %1142 = vrot.lane.b32.xlu2 %v1470_v60, %s1475_s19 }
0x140b   :  { %772 = vrot.lane.b32.xlu2 %v1786_v14, %s1476_s20 }
0x142c   :  { %v1204_v37 = vpop.f32.mrf.mxu0 }
0x142d   :  { %v1205_v1 = vadd.f32 %v1342_v63, %v1204_v37 }
0x142f   :  { %v1224_v49 = vmax.f32 %v1205_v1, 0.0 }
0x1431   :  { %v1233_v10 = vmin.f32 %v1232_v3, %v1224_v49 }
0x1433   :  { %1241 = vst.msk [vmem:[%s1930_s8] sm:$0xff] %vm58_vm1, %v1233_v10 }
0x1434   :  { %v1206_v15 = vpop.f32.mrf.mxu0 }
0x1435   :  { %v1207_v6 = vadd.f32 %v1342_v63, %v1206_v15 }
0x1437   :  { %v1225_v7 = vmax.f32 %v1207_v6, 0.0 }
0x1439   :  { %v1234_v53 = vmin.f32 %v1232_v3, %v1225_v7 }
0x143b   :  { %1242 = vst.msk [vmem:[%s1930_s8 + $0x8] sm:$0xff] %vm58_vm1, %v1234_v53 }
0x143c   :  { %v1209_v14 = vpop.f32.mrf.mxu0 }
0x143d   :  { %v1210_v18 = vadd.f32 %v1342_v63, %v1209_v14 }
0x143f   :  { %v1226_v4 = vmax.f32 %v1210_v18, 0.0 }
0x1441   :  { %v1235_v2 = vmin.f32 %v1232_v3, %v1226_v4 }
0x1443   :  { %1243 = vst.msk [vmem:[%s1930_s8 + $0x10] sm:$0xff] %vm58_vm1, %v1235_v2 }
0x1444   :  { %v1211_v17 = vpop.f32.mrf.mxu0 }
0x1445   :  { %v1212_v62 = vadd.f32 %v1342_v63, %v1211_v17 }
0x1447   :  { %v1227_v11 = vmax.f32 %v1212_v62, 0.0 }
0x1449   :  { %v1236_v21 = vmin.f32 %v1232_v3, %v1227_v11 }
0x144b   :  { %1244 = vst.msk [vmem:[%s1930_s8 + $0x18] sm:$0xff] %vm58_vm1, %v1236_v21 }
0x145d   :  { %v1143_v22 = vpop.permute.xlu2 %1142 }
0x145e   :  { %v1145_v41 = vmul.f32 %v1143_v22, %v1126_v29 }
0x1460   :  { %1147 = vrot.lane.b32.xlu2 %v1145_v41, %s1476_s20 }
0x1465   :  { %v773_v59 = vpop.permute.xlu2 %772 }
0x1466   :  { %775 = vst.msk [vmem:[#allocation2 + $0x20] sm:$0xff] %vm129_vm6, %v773_v59 }
0x146d   :  { %v1155_v19 = vld [vmem:[#allocation2 + $0x20] sm:$0xff] }
0x146e   :  { %v1161_v16 = vpack.c.bf16 %v1156_v43, %v1155_v19 }
0x1470   :  { %1322 = vmatmul.msk.bf16.gmra.mxu0 %vm129_vm6, %v1161_v16 }
0x14ba   :  { %v1148_v44 = vpop.permute.xlu2 %1147 }
0x14bb   :  { %1150 = vst.msk [vmem:[#allocation2 + $0x38] sm:$0xff] %vm129_vm6, %v1148_v44 }
0x14c2   :  { %v1158_v48 = vld [vmem:[#allocation2 + $0x38] sm:$0xff] }
0x14c3   :  { %v1162_v25 = vpack.c.bf16 %v1158_v48, %v1157_v24 }
0x14c5   :  { %1323 = vmatmul.msk.bf16.gmra.mxu0 %vm129_vm6, %v1162_v25 }
0x14ed   :  { %v1214_v26 = vpop.f32.mrf.mxu0 }
0x14ee   :  { %v1215_v27 = vadd.f32 %v1342_v63, %v1214_v26 }
0x14f0   :  { %v1228_v5 = vmax.f32 %v1215_v27, 0.0 }
0x14f2   :  { %v1237_v9 = vmin.f32 %v1232_v3, %v1228_v5 }
0x14f4   :  { %1245 = vst.msk [vmem:[%s1930_s8 + $0x20] sm:$0xff] %vm58_vm1, %v1237_v9 }
0x14f5   :  { %v1216_v8 = vpop.f32.mrf.mxu0 }
0x14f6   :  { %v1217_v12 = vadd.f32 %v1342_v63, %v1216_v8 }
0x14f8   :  { %v1229_v20 = vmax.f32 %v1217_v12, 0.0 }
0x14fa   :  { %v1238_v0 = vmin.f32 %v1232_v3, %v1229_v20 }
0x14fc   :  { %1246 = vst.msk [vmem:[%s1930_s8 + $0x28] sm:$0xff] %vm58_vm1, %v1238_v0 }
0x1542   :  { %v1219_v23 = vpop.f32.mrf.mxu0 }
0x1543   :  { %v1220_v56 = vadd.f32 %v1342_v63, %v1219_v23 }
0x1545   :  { %v1230_v13 = vmax.f32 %v1220_v56, 0.0 }
0x1547   :  { %v1239_v57 = vmin.f32 %v1232_v3, %v1230_v13 }
0x1549   :  { %1247 = vst.msk [vmem:[%s1930_s8 + $0x30] sm:$0xff] %vm58_vm1, %v1239_v57 }
0x154a   :  { %v1221_v61 = vpop.f32.mrf.mxu0 }
0x154b   :  { %v1222_v28 = vadd.f32 %v1342_v63, %v1221_v61 }
0x154d   :  { %v1231_v29 = vmax.f32 %v1222_v28, 0.0 }
0x154f   :  { %v1240_v30 = vmin.f32 %v1232_v3, %v1231_v29 }
0x1551   :  { %1248 = vst.msk [vmem:[%s1930_s8 + $0x38] sm:$0xff] %vm58_vm1, %v1240_v30 }

</bundles_post_ra>
